<compile_context>
chip_gen: v7x
topology: tpu7x:2x2x1
jax: 0.10.0
libtpu: 0.0.40
codegen_flags: <defaults>
</compile_context>

<pallas_src>
import functools

import jax
import jax.numpy as jnp
import numpy as np
from jax import lax
from jax.experimental import pallas as pl
from jax.experimental.pallas import tpu as pltpu


# ----------------------------- configuration --------------------------------
BATCH = 2
SEQ = 8
IN_DIM = 16
D_SYMBOLS = 8
D_ROLES = 4
N_SYMBOLS = 10
N_ROLES = 6
OUT_DIM = D_SYMBOLS * D_ROLES          # 32
TEMPERATURE = 0.5
DTYPE = jnp.float32


# ------------------------------- kernel --------------------------------------
def tpr_lstm_kernel(
    # inputs
    x_ref,        # (S*Bp, in_dim)   time-major, batch-padded
    wih_ref,      # (in_dim, 8H)     gate-permuted [iF iR | fF fR | gF gR | oF oR]
    whh_ref,      # (H, 8H)          gate-permuted
    b_ref,        # (1, 8H)          gate-permuted, b_ih + b_hh pre-summed
    wa_ref,       # (H, nS+nR)       [waF_w | waR_w] / temperature
    cmask_ref,    # (2Bp, nS+nR)     bias/temperature + quadrant mask (-1e9)
    witem_ref,    # (nS+nR, H)       [Fw@EF ; Rw@ER]  (outer-product expansion folded in)
    bitem_ref,    # (2Bp, H)         rows 0:Bp = Fb@EF, rows Bp:2Bp = Rb@ER
    # outputs
    outT_ref,     # (S, Bp, H)
    outP_ref,     # (S, 2Bp, nS+nR)  masked-softmax tile (F probs in top-left, R in bottom-right)
    # scratch
    xp_ref,       # (S*Bp, 8H)       precomputed input projections (+ gate bias)
    *, seq, batch, h,
):
    H2 = 2 * h   # lane width of one regrouped gate pair, and of the [cF|cR] carry

    # ---- prologue: all-timestep input projection, one well-occupied matmul ----
    xp_ref[...] = (
        jnp.dot(x_ref[...], wih_ref[...], preferred_element_type=jnp.float32)
        + b_ref[...]
    )

    # loop-invariant weight reads (hoisted)
    whh = whh_ref[...]
    wa = wa_ref[...]
    cmask = cmask_ref[...]
    witem = witem_ref[...]
    bitem = bitem_ref[...]

    def step(t, carry):
        T_prev, c_cat = carry                                   # (Bp,H), (Bp,2H)=[cF|cR]

        start = pl.multiple_of(t * batch, batch)
        # single fused recurrent matmul for BOTH cells (hF_prev == hR_prev == T)
        g = xp_ref[pl.ds(start, batch), :] + jnp.dot(
            T_prev, whh, preferred_element_type=jnp.float32)    # (Bp, 8H)

        # regrouped gates: 4 wide transcendental calls instead of 10 narrow ones
        sig_if = jax.nn.sigmoid(g[:, 0:2 * H2])                 # (Bp, 4H) = [iF iR | fF fR]
        i_cat = sig_if[:, 0:H2]                                 # (Bp, 2H) = [iF | iR]
        f_cat = sig_if[:, H2:2 * H2]                            # (Bp, 2H) = [fF | fR]
        g_cat = jnp.tanh(g[:, 2 * H2:3 * H2])                   # (Bp, 2H) = [gF | gR]
        o_cat = jax.nn.sigmoid(g[:, 3 * H2:4 * H2])             # (Bp, 2H) = [oF | oR]
        c_new = f_cat * c_cat + i_cat * g_cat                   # (Bp, 2H) = [cF | cR]
        h_cat = o_cat * jnp.tanh(c_new)                         # (Bp, 2H) = [hF | hR]

        # batch-stack hF/hR -> one attention matmul + ONE masked softmax
        h_stack = jnp.concatenate([h_cat[:, 0:h], h_cat[:, h:H2]], axis=0)   # (2Bp, H)
        z = jnp.dot(h_stack, wa, preferred_element_type=jnp.float32) + cmask  # bias+mask folded
        m = jnp.max(z, axis=-1, keepdims=True)
        e = jnp.exp(z - m)                                      # masked lanes -> exactly 0
        p = e * pl.reciprocal(jnp.sum(e, axis=-1, keepdims=True), approx=True)

        # fused item matmul (cross terms are exact zeros) + flattened outer product
        q = jnp.dot(p, witem, preferred_element_type=jnp.float32) + bitem     # (2Bp, H)
        T = q[0:batch, :] * q[batch:2 * batch, :]                             # (Bp, H)

        # natural-tile stores (no lane concat, no unaligned masked stores)
        outT_ref[t] = T
        outP_ref[t] = p

        # recurrence: hidden h of BOTH LSTMs replaced by T, cell states carried
        return (T, c_new)

    init = (jnp.zeros((batch, h), jnp.float32),
            jnp.zeros((batch, H2), jnp.float32))
    lax.fori_loop(0, seq, step, init, unroll=True)


# ------------------------------- wrapper --------------------------------------
def tpr_encoder_lstm_forward(x, params, *, temperature=TEMPERATURE,
                             d_symbols=D_SYMBOLS, d_roles=D_ROLES):
    """x: (batch, seq, in_dim) float32. Returns (out, aFs, aRs) batch-major.

    Only the n_layers==1 / unidirectional / LSTM path of the PyTorch module."""
    B, S, in_dim = x.shape
    H = d_symbols * d_roles
    nS = params["waF_w"].shape[1]
    nR = params["waR_w"].shape[1]

    # pad batch to f32 sublane multiple (8)
    Bp = max(8, ((B + 7) // 8) * 8)
    x_p = jnp.zeros((Bp, S, in_dim), DTYPE).at[:B].set(x)
    x_tm = jnp.transpose(x_p, (1, 0, 2)).reshape(S * Bp, in_dim)   # time-major, flat

    # --- host-side weight packing ---
    # gate-column permutation: [iF fF gF oF | iR fR gR oR] -> [iF iR | fF fR | gF gR | oF oR]
    perm = np.concatenate([np.arange(H) + blk * H for blk in (0, 4, 1, 5, 2, 6, 3, 7)])
    wih_cat = jnp.concatenate([params["wihF"], params["wihR"]], axis=1)[:, perm]   # (in_dim, 8H)
    whh_cat = jnp.concatenate([params["whhF"], params["whhR"]], axis=1)[:, perm]   # (H, 8H)
    b_cat = jnp.concatenate([params["bF"], params["bR"]], axis=1)[:, perm]         # (1, 8H)

    # attention: fold 1/temperature into weight & bias; combine bias with the quadrant
    # mask used by the single masked softmax over the batch-stacked [hF; hR] logits.
    wa_cat = jnp.concatenate([params["waF_w"], params["waR_w"]], axis=1) / temperature  # (H, nS+nR)
    NEG = jnp.float32(-1e9)
    row_f = jnp.concatenate([params["waF_b"][0] / temperature, jnp.full((nR,), NEG, DTYPE)])
    row_r = jnp.concatenate([jnp.full((nS,), NEG, DTYPE), params["waR_b"][0] / temperature])
    cmask = jnp.concatenate([jnp.tile(row_f[None, :], (Bp, 1)),
                             jnp.tile(row_r[None, :], (Bp, 1))], axis=0)            # (2Bp, nS+nR)

    # 0/1 expansion matrices: fold T[b, s*dR+r] = itemF[b,s]*itemR[b,r] into F/R weights
    cols = jnp.arange(H)
    EF = (cols[None, :] // d_roles == jnp.arange(d_symbols)[:, None]).astype(DTYPE)  # (dS, H)
    ER = (cols[None, :] % d_roles == jnp.arange(d_roles)[:, None]).astype(DTYPE)     # (dR, H)
    witem = jnp.concatenate([params["Fw"] @ EF, params["Rw"] @ ER], axis=0)          # (nS+nR, H)
    bitem = jnp.concatenate([jnp.tile(params["Fb"] @ EF, (Bp, 1)),
                             jnp.tile(params["Rb"] @ ER, (Bp, 1))], axis=0)          # (2Bp, H)

    inputs = [x_tm, wih_cat, whh_cat, b_cat, wa_cat, cmask, witem, bitem]

    def full_spec(arr):
        nd = arr.ndim
        return pl.BlockSpec(arr.shape, lambda i, _nd=nd: (0,) * _nd)

    kernel = functools.partial(tpr_lstm_kernel, seq=S, batch=Bp, h=H)

    outT, outP = pl.pallas_call(
        kernel,
        out_shape=(jax.ShapeDtypeStruct((S, Bp, H), DTYPE),
                   jax.ShapeDtypeStruct((S, 2 * Bp, nS + nR), DTYPE)),
        grid_spec=pltpu.PrefetchScalarGridSpec(
            num_scalar_prefetch=0,
            grid=(1,),                                    # single invocation; time loop in-kernel
            in_specs=[full_spec(a) for a in inputs],
            out_specs=[pl.BlockSpec((S, Bp, H), lambda i: (0, 0, 0)),
                       pl.BlockSpec((S, 2 * Bp, nS + nR), lambda i: (0, 0, 0))],
            scratch_shapes=[pltpu.VMEM((S * Bp, 8 * H), jnp.float32)],   # xproj
        ),
        compiler_params=pltpu.CompilerParams(
            dimension_semantics=("arbitrary",),
        ),
    )(*inputs)

    out = jnp.transpose(outT[:, :B, :], (1, 0, 2))
    aFs = jnp.transpose(outP[:, :B, 0:nS], (1, 0, 2))
    aRs = jnp.transpose(outP[:, Bp:Bp + B, nS:nS + nR], (1, 0, 2))
    return out, aFs, aRs


# --------------------------- pure-JAX reference -------------------------------
def reference_forward(x, params, *, temperature=TEMPERATURE,
                      d_symbols=D_SYMBOLS, d_roles=D_ROLES):
    B, S, _ = x.shape
    H = d_symbols * d_roles
    hF = jnp.zeros((B, H), DTYPE); cF = jnp.zeros((B, H), DTYPE)
    hR = jnp.zeros((B, H), DTYPE); cR = jnp.zeros((B, H), DTYPE)

    def step(x_t, h, c, wih, whh, b):
        g = x_t @ wih + h @ whh + b
        i = jax.nn.sigmoid(g[:, 0:H]); f = jax.nn.sigmoid(g[:, H:2 * H])
        gg = jnp.tanh(g[:, 2 * H:3 * H]); o = jax.nn.sigmoid(g[:, 3 * H:4 * H])
        c2 = f * c + i * gg
        return o * jnp.tanh(c2), c2

    outs, aFs, aRs = [], [], []
    for t in range(S):
        x_t = x[:, t, :]
        hF_o, cF = step(x_t, hF, cF, params["wihF"], params["whhF"], params["bF"])
        hR_o, cR = step(x_t, hR, cR, params["wihR"], params["whhR"], params["bR"])
        aF = jax.nn.softmax((hF_o @ params["waF_w"] + params["waF_b"]) / temperature, axis=-1)
        aR = jax.nn.softmax((hR_o @ params["waR_w"] + params["waR_b"]) / temperature, axis=-1)
        itemF = aF @ params["Fw"] + params["Fb"]
        itemR = aR @ params["Rw"] + params["Rb"]
        T = (itemF[:, :, None] * itemR[:, None, :]).reshape(B, H)
        hF = T; hR = T
        outs.append(T); aFs.append(aF); aRs.append(aR)
    return jnp.stack(outs, 1), jnp.stack(aFs, 1), jnp.stack(aRs, 1)


# --------------------------- deterministic params -----------------------------
def make_params(key):
    ks = jax.random.split(key, 20)
    u = lambda k, shape: jax.random.uniform(k, shape, DTYPE, -0.1, 0.1)
    H, G = OUT_DIM, 4 * OUT_DIM
    # LSTM weights stored pre-transposed: (in_features, out_features).
    # The two PyTorch biases b_ih + b_hh are pre-summed into one (1, 4H) bias.
    return {
        "wihF": u(ks[0], (IN_DIM, G)), "whhF": u(ks[1], (H, G)),
        "bF": u(ks[2], (1, G)) + u(ks[3], (1, G)),
        "wihR": u(ks[4], (IN_DIM, G)), "whhR": u(ks[5], (H, G)),
        "bR": u(ks[6], (1, G)) + u(ks[7], (1, G)),
        "waF_w": u(ks[8], (H, N_SYMBOLS)), "waF_b": u(ks[9], (1, N_SYMBOLS)),
        "waR_w": u(ks[10], (H, N_ROLES)), "waR_b": u(ks[11], (1, N_ROLES)),
        "Fw": u(ks[12], (N_SYMBOLS, D_SYMBOLS)), "Fb": u(ks[13], (1, D_SYMBOLS)),
        "Rw": u(ks[14], (N_ROLES, D_ROLES)), "Rb": u(ks[15], (1, D_ROLES)),
    }


# ----------------------------------- main --------------------------------------
if __name__ == "__main__":
    key = jax.random.PRNGKey(0)
    k_x, k_p = jax.random.split(key)
    x = jax.random.normal(k_x, (BATCH, SEQ, IN_DIM), DTYPE)
    params = make_params(k_p)

    out, aFs, aRs = jax.block_until_ready(tpr_encoder_lstm_forward(x, params))

    out_r, aFs_r, aRs_r = reference_forward(x, params)
    np.testing.assert_allclose(np.asarray(out), np.asarray(out_r), atol=2e-3, rtol=2e-3)
    np.testing.assert_allclose(np.asarray(aFs), np.asarray(aFs_r), atol=2e-3, rtol=2e-3)
    np.testing.assert_allclose(np.asarray(aRs), np.asarray(aRs_r), atol=2e-3, rtol=2e-3)

    assert out.shape == (BATCH, SEQ, OUT_DIM)
    assert aFs.shape == (BATCH, SEQ, N_SYMBOLS)
    assert aRs.shape == (BATCH, SEQ, N_ROLES)
    print("KERNEL_OK")
</pallas_src>

<mosaic_0001>
module attributes {stable_mosaic.version = 11 : i64} {
  func.func @tpr_lstm_kernel(%arg0: i32, %arg1: memref<64x16xf32, #tpu.memory_space<vmem>>, %arg2: memref<16x256xf32, #tpu.memory_space<vmem>>, %arg3: memref<32x256xf32, #tpu.memory_space<vmem>>, %arg4: memref<1x256xf32, #tpu.memory_space<vmem>>, %arg5: memref<32x16xf32, #tpu.memory_space<vmem>>, %arg6: memref<16x16xf32, #tpu.memory_space<vmem>>, %arg7: memref<16x32xf32, #tpu.memory_space<vmem>>, %arg8: memref<16x32xf32, #tpu.memory_space<vmem>>, %arg9: memref<8x8x32xf32, #tpu.memory_space<vmem>>, %arg10: memref<8x16x16xf32, #tpu.memory_space<vmem>>, %arg11: memref<64x256xf32, #tpu.memory_space<vmem>>) attributes {dimension_semantics = [#tpu.dimension_semantics<arbitrary>], iteration_bounds = array<i64: 1>, scalar_prefetch = 0 : i64, scratch_operands = 1 : i64, tpu.core_type = #tpu.core_type<tc>, window_params = [{pipeline_mode = #tpu.pipeline_mode<synchronous>, transform_indices = @transform_0, window_bounds = array<i64: 64, 16>}, {pipeline_mode = #tpu.pipeline_mode<synchronous>, transform_indices = @transform_1, window_bounds = array<i64: 16, 256>}, {pipeline_mode = #tpu.pipeline_mode<synchronous>, transform_indices = @transform_2, window_bounds = array<i64: 32, 256>}, {pipeline_mode = #tpu.pipeline_mode<synchronous>, transform_indices = @transform_3, window_bounds = array<i64: 1, 256>}, {pipeline_mode = #tpu.pipeline_mode<synchronous>, transform_indices = @transform_4, window_bounds = array<i64: 32, 16>}, {pipeline_mode = #tpu.pipeline_mode<synchronous>, transform_indices = @transform_5, window_bounds = array<i64: 16, 16>}, {pipeline_mode = #tpu.pipeline_mode<synchronous>, transform_indices = @transform_6, window_bounds = array<i64: 16, 32>}, {pipeline_mode = #tpu.pipeline_mode<synchronous>, transform_indices = @transform_7, window_bounds = array<i64: 16, 32>}, {pipeline_mode = #tpu.pipeline_mode<synchronous>, transform_indices = @transform_8, window_bounds = array<i64: 8, 8, 32>}, {pipeline_mode = #tpu.pipeline_mode<synchronous>, transform_indices = @transform_9, window_bounds = array<i64: 8, 16, 16>}]} {
    %c0 = arith.constant 0 : index
    %c0_0 = arith.constant 0 : index
    %0 = vector.load %arg1[%c0, %c0_0] : memref<64x16xf32, #tpu.memory_space<vmem>>, vector<64x16xf32>
    %c0_1 = arith.constant 0 : index
    %c0_2 = arith.constant 0 : index
    %1 = vector.load %arg2[%c0_1, %c0_2] : memref<16x256xf32, #tpu.memory_space<vmem>>, vector<16x256xf32>
    %cst = arith.constant dense<0.000000e+00> : vector<64x256xf32>
    %2 = tpu.matmul %0, %1, %cst {dimension_numbers = #tpu.dot_dimension_numbers<[1], [0], [0], [1], [0, 0, 1, 1], [], []>} : vector<64x16xf32>, vector<16x256xf32>, vector<64x256xf32> -> vector<64x256xf32>
    %c0_3 = arith.constant 0 : index
    %c0_4 = arith.constant 0 : index
    %3 = vector.load %arg4[%c0_3, %c0_4] : memref<1x256xf32, #tpu.memory_space<vmem>>, vector<1x256xf32>
    %4 = vector.broadcast %3 : vector<1x256xf32> to vector<64x256xf32>
    %5 = arith.addf %2, %4 : vector<64x256xf32>
    %c0_5 = arith.constant 0 : index
    %c0_6 = arith.constant 0 : index
    %6 = vector.load %arg11[%c0_5, %c0_6] : memref<64x256xf32, #tpu.memory_space<vmem>>, vector<64x256xf32>
    tpu.vector_store %arg11[%c0_5, %c0_6], %5 {strides = array<i32>} : memref<64x256xf32, #tpu.memory_space<vmem>>, vector<64x256xf32>,
    %c0_7 = arith.constant 0 : index
    %c0_8 = arith.constant 0 : index
    %7 = vector.load %arg3[%c0_7, %c0_8] : memref<32x256xf32, #tpu.memory_space<vmem>>, vector<32x256xf32>
    %c0_9 = arith.constant 0 : index
    %c0_10 = arith.constant 0 : index
    %8 = vector.load %arg5[%c0_9, %c0_10] : memref<32x16xf32, #tpu.memory_space<vmem>>, vector<32x16xf32>
    %c0_11 = arith.constant 0 : index
    %c0_12 = arith.constant 0 : index
    %9 = vector.load %arg6[%c0_11, %c0_12] : memref<16x16xf32, #tpu.memory_space<vmem>>, vector<16x16xf32>
    %c0_13 = arith.constant 0 : index
    %c0_14 = arith.constant 0 : index
    %10 = vector.load %arg7[%c0_13, %c0_14] : memref<16x32xf32, #tpu.memory_space<vmem>>, vector<16x32xf32>
    %c0_15 = arith.constant 0 : index
    %c0_16 = arith.constant 0 : index
    %11 = vector.load %arg8[%c0_15, %c0_16] : memref<16x32xf32, #tpu.memory_space<vmem>>, vector<16x32xf32>
    %cst_17 = arith.constant 0.000000e+00 : f32
    %12 = vector.broadcast %cst_17 : f32 to vector<8x32xf32>
    %cst_18 = arith.constant 0.000000e+00 : f32
    %13 = vector.broadcast %cst_18 : f32 to vector<8x64xf32>
    %c0_i32 = arith.constant 0 : i32
    %c8_i32 = arith.constant 8 : i32
    %14 = arith.muli %c0_i32, %c8_i32 : i32
    %15 = tpu.assume_multiple %14, 8 : i32
    %16 = arith.index_cast %15 : i32 to index
    %c0_19 = arith.constant 0 : index
    %17 = vector.load %arg11[%16, %c0_19] : memref<64x256xf32, #tpu.memory_space<vmem>>, vector<8x256xf32>
    %cst_20 = arith.constant dense<0.000000e+00> : vector<8x256xf32>
    %18 = tpu.matmul %12, %7, %cst_20 {dimension_numbers = #tpu.dot_dimension_numbers<[1], [0], [0], [1], [0, 0, 1, 1], [], []>} : vector<8x32xf32>, vector<32x256xf32>, vector<8x256xf32> -> vector<8x256xf32>
    %19 = arith.addf %17, %18 : vector<8x256xf32>
    %20 = vector.extract_strided_slice %19 {offsets = [0, 0], sizes = [8, 128], strides = [1, 1]} : vector<8x256xf32> to vector<8x128xf32>
    %21 = arith.negf %20 : vector<8x128xf32>
    %22 = math.exp %21 : vector<8x128xf32>
    %cst_21 = arith.constant 1.000000e+00 : f32
    %23 = vector.broadcast %cst_21 : f32 to vector<8x128xf32>
    %24 = arith.addf %23, %22 : vector<8x128xf32>
    %25 = arith.divf %23, %24 : vector<8x128xf32>
    %26 = vector.extract_strided_slice %25 {offsets = [0, 0], sizes = [8, 64], strides = [1, 1]} : vector<8x128xf32> to vector<8x64xf32>
    %27 = vector.extract_strided_slice %25 {offsets = [0, 64], sizes = [8, 64], strides = [1, 1]} : vector<8x128xf32> to vector<8x64xf32>
    %28 = vector.extract_strided_slice %19 {offsets = [0, 128], sizes = [8, 64], strides = [1, 1]} : vector<8x256xf32> to vector<8x64xf32>
    %29 = math.tanh %28 : vector<8x64xf32>
    %30 = vector.extract_strided_slice %19 {offsets = [0, 192], sizes = [8, 64], strides = [1, 1]} : vector<8x256xf32> to vector<8x64xf32>
    %31 = arith.negf %30 : vector<8x64xf32>
    %32 = math.exp %31 : vector<8x64xf32>
    %cst_22 = arith.constant 1.000000e+00 : f32
    %33 = vector.broadcast %cst_22 : f32 to vector<8x64xf32>
    %34 = arith.addf %33, %32 : vector<8x64xf32>
    %35 = arith.divf %33, %34 : vector<8x64xf32>
    %36 = arith.mulf %27, %13 : vector<8x64xf32>
    %37 = arith.mulf %26, %29 : vector<8x64xf32>
    %38 = arith.addf %36, %37 : vector<8x64xf32>
    %39 = math.tanh %38 : vector<8x64xf32>
    %40 = arith.mulf %35, %39 : vector<8x64xf32>
    %41 = vector.extract_strided_slice %40 {offsets = [0, 0], sizes = [8, 32], strides = [1, 1]} : vector<8x64xf32> to vector<8x32xf32>
    %42 = vector.extract_strided_slice %40 {offsets = [0, 32], sizes = [8, 32], strides = [1, 1]} : vector<8x64xf32> to vector<8x32xf32>
    %43 = tpu.concatenate %41, %42 in 0 : vector<8x32xf32>, vector<8x32xf32> -> vector<16x32xf32>
    %cst_23 = arith.constant dense<0.000000e+00> : vector<16x16xf32>
    %44 = tpu.matmul %43, %8, %cst_23 {dimension_numbers = #tpu.dot_dimension_numbers<[1], [0], [0], [1], [0, 0, 1, 1], [], []>} : vector<16x32xf32>, vector<32x16xf32>, vector<16x16xf32> -> vector<16x16xf32>
    %45 = arith.addf %44, %9 : vector<16x16xf32>
    %cst_24 = arith.constant dense<0xFF800000> : vector<16xf32>
    %46 = vector.multi_reduction <maximumf>, %45, %cst_24 [1] : vector<16x16xf32> to vector<16xf32>
    %47 = vector.shape_cast %46 : vector<16xf32> to vector<16x1xf32>
    %48 = vector.broadcast %47 : vector<16x1xf32> to vector<16x16xf32>
    %49 = arith.subf %45, %48 : vector<16x16xf32>
    %50 = math.exp %49 : vector<16x16xf32>
    %cst_25 = arith.constant dense<0.000000e+00> : vector<16xf32>
    %51 = vector.multi_reduction <add>, %50, %cst_25 [1] : vector<16x16xf32> to vector<16xf32>
    %52 = vector.shape_cast %51 : vector<16xf32> to vector<16x1xf32>
    %53 = tpu.reciprocal %52 {approx = true} : vector<16x1xf32> -> vector<16x1xf32>
    %54 = vector.broadcast %53 : vector<16x1xf32> to vector<16x16xf32>
    %55 = arith.mulf %50, %54 : vector<16x16xf32>
    %cst_26 = arith.constant dense<0.000000e+00> : vector<16x32xf32>
    %56 = tpu.matmul %55, %10, %cst_26 {dimension_numbers = #tpu.dot_dimension_numbers<[1], [0], [0], [1], [0, 0, 1, 1], [], []>} : vector<16x16xf32>, vector<16x32xf32>, vector<16x32xf32> -> vector<16x32xf32>
    %57 = arith.addf %56, %11 : vector<16x32xf32>
    %58 = vector.extract_strided_slice %57 {offsets = [0, 0], sizes = [8, 32], strides = [1, 1]} : vector<16x32xf32> to vector<8x32xf32>
    %59 = vector.extract_strided_slice %57 {offsets = [8, 0], sizes = [8, 32], strides = [1, 1]} : vector<16x32xf32> to vector<8x32xf32>
    %60 = arith.mulf %58, %59 : vector<8x32xf32>
    %61 = arith.index_cast %c0_i32 : i32 to index
    %c0_27 = arith.constant 0 : index
    %c0_28 = arith.constant 0 : index
    %62 = vector.load %arg9[%61, %c0_27, %c0_28] : memref<8x8x32xf32, #tpu.memory_space<vmem>>, vector<1x8x32xf32>
    %63 = vector.shape_cast %62 : vector<1x8x32xf32> to vector<8x32xf32>
    %64 = vector.shape_cast %60 : vector<8x32xf32> to vector<1x8x32xf32>
    tpu.vector_store %arg9[%61, %c0_27, %c0_28], %64 {strides = array<i32>} : memref<8x8x32xf32, #tpu.memory_space<vmem>>, vector<1x8x32xf32>,
    %65 = arith.index_cast %c0_i32 : i32 to index
    %c0_29 = arith.constant 0 : index
    %c0_30 = arith.constant 0 : index
    %66 = vector.load %arg10[%65, %c0_29, %c0_30] : memref<8x16x16xf32, #tpu.memory_space<vmem>>, vector<1x16x16xf32>
    %67 = vector.shape_cast %66 : vector<1x16x16xf32> to vector<16x16xf32>
    %68 = vector.shape_cast %55 : vector<16x16xf32> to vector<1x16x16xf32>
    tpu.vector_store %arg10[%65, %c0_29, %c0_30], %68 {strides = array<i32>} : memref<8x16x16xf32, #tpu.memory_space<vmem>>, vector<1x16x16xf32>,
    %c1_i32 = arith.constant 1 : i32
    %c8_i32_31 = arith.constant 8 : i32
    %69 = arith.muli %c1_i32, %c8_i32_31 : i32
    %70 = tpu.assume_multiple %69, 8 : i32
    %71 = arith.index_cast %70 : i32 to index
    %c0_32 = arith.constant 0 : index
    %72 = vector.load %arg11[%71, %c0_32] : memref<64x256xf32, #tpu.memory_space<vmem>>, vector<8x256xf32>
    %cst_33 = arith.constant dense<0.000000e+00> : vector<8x256xf32>
    %73 = tpu.matmul %60, %7, %cst_33 {dimension_numbers = #tpu.dot_dimension_numbers<[1], [0], [0], [1], [0, 0, 1, 1], [], []>} : vector<8x32xf32>, vector<32x256xf32>, vector<8x256xf32> -> vector<8x256xf32>
    %74 = arith.addf %72, %73 : vector<8x256xf32>
    %75 = vector.extract_strided_slice %74 {offsets = [0, 0], sizes = [8, 128], strides = [1, 1]} : vector<8x256xf32> to vector<8x128xf32>
    %76 = arith.negf %75 : vector<8x128xf32>
    %77 = math.exp %76 : vector<8x128xf32>
    %cst_34 = arith.constant 1.000000e+00 : f32
    %78 = vector.broadcast %cst_34 : f32 to vector<8x128xf32>
    %79 = arith.addf %78, %77 : vector<8x128xf32>
    %80 = arith.divf %78, %79 : vector<8x128xf32>
    %81 = vector.extract_strided_slice %80 {offsets = [0, 0], sizes = [8, 64], strides = [1, 1]} : vector<8x128xf32> to vector<8x64xf32>
    %82 = vector.extract_strided_slice %80 {offsets = [0, 64], sizes = [8, 64], strides = [1, 1]} : vector<8x128xf32> to vector<8x64xf32>
    %83 = vector.extract_strided_slice %74 {offsets = [0, 128], sizes = [8, 64], strides = [1, 1]} : vector<8x256xf32> to vector<8x64xf32>
    %84 = math.tanh %83 : vector<8x64xf32>
    %85 = vector.extract_strided_slice %74 {offsets = [0, 192], sizes = [8, 64], strides = [1, 1]} : vector<8x256xf32> to vector<8x64xf32>
    %86 = arith.negf %85 : vector<8x64xf32>
    %87 = math.exp %86 : vector<8x64xf32>
    %cst_35 = arith.constant 1.000000e+00 : f32
    %88 = vector.broadcast %cst_35 : f32 to vector<8x64xf32>
    %89 = arith.addf %88, %87 : vector<8x64xf32>
    %90 = arith.divf %88, %89 : vector<8x64xf32>
    %91 = arith.mulf %82, %38 : vector<8x64xf32>
    %92 = arith.mulf %81, %84 : vector<8x64xf32>
    %93 = arith.addf %91, %92 : vector<8x64xf32>
    %94 = math.tanh %93 : vector<8x64xf32>
    %95 = arith.mulf %90, %94 : vector<8x64xf32>
    %96 = vector.extract_strided_slice %95 {offsets = [0, 0], sizes = [8, 32], strides = [1, 1]} : vector<8x64xf32> to vector<8x32xf32>
    %97 = vector.extract_strided_slice %95 {offsets = [0, 32], sizes = [8, 32], strides = [1, 1]} : vector<8x64xf32> to vector<8x32xf32>
    %98 = tpu.concatenate %96, %97 in 0 : vector<8x32xf32>, vector<8x32xf32> -> vector<16x32xf32>
    %cst_36 = arith.constant dense<0.000000e+00> : vector<16x16xf32>
    %99 = tpu.matmul %98, %8, %cst_36 {dimension_numbers = #tpu.dot_dimension_numbers<[1], [0], [0], [1], [0, 0, 1, 1], [], []>} : vector<16x32xf32>, vector<32x16xf32>, vector<16x16xf32> -> vector<16x16xf32>
    %100 = arith.addf %99, %9 : vector<16x16xf32>
    %cst_37 = arith.constant dense<0xFF800000> : vector<16xf32>
    %101 = vector.multi_reduction <maximumf>, %100, %cst_37 [1] : vector<16x16xf32> to vector<16xf32>
    %102 = vector.shape_cast %101 : vector<16xf32> to vector<16x1xf32>
    %103 = vector.broadcast %102 : vector<16x1xf32> to vector<16x16xf32>
    %104 = arith.subf %100, %103 : vector<16x16xf32>
    %105 = math.exp %104 : vector<16x16xf32>
    %cst_38 = arith.constant dense<0.000000e+00> : vector<16xf32>
    %106 = vector.multi_reduction <add>, %105, %cst_38 [1] : vector<16x16xf32> to vector<16xf32>
    %107 = vector.shape_cast %106 : vector<16xf32> to vector<16x1xf32>
    %108 = tpu.reciprocal %107 {approx = true} : vector<16x1xf32> -> vector<16x1xf32>
    %109 = vector.broadcast %108 : vector<16x1xf32> to vector<16x16xf32>
    %110 = arith.mulf %105, %109 : vector<16x16xf32>
    %cst_39 = arith.constant dense<0.000000e+00> : vector<16x32xf32>
    %111 = tpu.matmul %110, %10, %cst_39 {dimension_numbers = #tpu.dot_dimension_numbers<[1], [0], [0], [1], [0, 0, 1, 1], [], []>} : vector<16x16xf32>, vector<16x32xf32>, vector<16x32xf32> -> vector<16x32xf32>
    %112 = arith.addf %111, %11 : vector<16x32xf32>
    %113 = vector.extract_strided_slice %112 {offsets = [0, 0], sizes = [8, 32], strides = [1, 1]} : vector<16x32xf32> to vector<8x32xf32>
    %114 = vector.extract_strided_slice %112 {offsets = [8, 0], sizes = [8, 32], strides = [1, 1]} : vector<16x32xf32> to vector<8x32xf32>
    %115 = arith.mulf %113, %114 : vector<8x32xf32>
    %116 = arith.index_cast %c1_i32 : i32 to index
    %c0_40 = arith.constant 0 : index
    %c0_41 = arith.constant 0 : index
    %117 = vector.load %arg9[%116, %c0_40, %c0_41] : memref<8x8x32xf32, #tpu.memory_space<vmem>>, vector<1x8x32xf32>
    %118 = vector.shape_cast %117 : vector<1x8x32xf32> to vector<8x32xf32>
    %119 = vector.shape_cast %115 : vector<8x32xf32> to vector<1x8x32xf32>
    tpu.vector_store %arg9[%116, %c0_40, %c0_41], %119 {strides = array<i32>} : memref<8x8x32xf32, #tpu.memory_space<vmem>>, vector<1x8x32xf32>,
    %120 = arith.index_cast %c1_i32 : i32 to index
    %c0_42 = arith.constant 0 : index
    %c0_43 = arith.constant 0 : index
    %121 = vector.load %arg10[%120, %c0_42, %c0_43] : memref<8x16x16xf32, #tpu.memory_space<vmem>>, vector<1x16x16xf32>
    %122 = vector.shape_cast %121 : vector<1x16x16xf32> to vector<16x16xf32>
    %123 = vector.shape_cast %110 : vector<16x16xf32> to vector<1x16x16xf32>
    tpu.vector_store %arg10[%120, %c0_42, %c0_43], %123 {strides = array<i32>} : memref<8x16x16xf32, #tpu.memory_space<vmem>>, vector<1x16x16xf32>,
    %c2_i32 = arith.constant 2 : i32
    %c8_i32_44 = arith.constant 8 : i32
    %124 = arith.muli %c2_i32, %c8_i32_44 : i32
    %125 = tpu.assume_multiple %124, 8 : i32
    %126 = arith.index_cast %125 : i32 to index
    %c0_45 = arith.constant 0 : index
    %127 = vector.load %arg11[%126, %c0_45] : memref<64x256xf32, #tpu.memory_space<vmem>>, vector<8x256xf32>
    %cst_46 = arith.constant dense<0.000000e+00> : vector<8x256xf32>
    %128 = tpu.matmul %115, %7, %cst_46 {dimension_numbers = #tpu.dot_dimension_numbers<[1], [0], [0], [1], [0, 0, 1, 1], [], []>} : vector<8x32xf32>, vector<32x256xf32>, vector<8x256xf32> -> vector<8x256xf32>
    %129 = arith.addf %127, %128 : vector<8x256xf32>
    %130 = vector.extract_strided_slice %129 {offsets = [0, 0], sizes = [8, 128], strides = [1, 1]} : vector<8x256xf32> to vector<8x128xf32>
    %131 = arith.negf %130 : vector<8x128xf32>
    %132 = math.exp %131 : vector<8x128xf32>
    %cst_47 = arith.constant 1.000000e+00 : f32
    %133 = vector.broadcast %cst_47 : f32 to vector<8x128xf32>
    %134 = arith.addf %133, %132 : vector<8x128xf32>
    %135 = arith.divf %133, %134 : vector<8x128xf32>
    %136 = vector.extract_strided_slice %135 {offsets = [0, 0], sizes = [8, 64], strides = [1, 1]} : vector<8x128xf32> to vector<8x64xf32>
    %137 = vector.extract_strided_slice %135 {offsets = [0, 64], sizes = [8, 64], strides = [1, 1]} : vector<8x128xf32> to vector<8x64xf32>
    %138 = vector.extract_strided_slice %129 {offsets = [0, 128], sizes = [8, 64], strides = [1, 1]} : vector<8x256xf32> to vector<8x64xf32>
    %139 = math.tanh %138 : vector<8x64xf32>
    %140 = vector.extract_strided_slice %129 {offsets = [0, 192], sizes = [8, 64], strides = [1, 1]} : vector<8x256xf32> to vector<8x64xf32>
    %141 = arith.negf %140 : vector<8x64xf32>
    %142 = math.exp %141 : vector<8x64xf32>
    %cst_48 = arith.constant 1.000000e+00 : f32
    %143 = vector.broadcast %cst_48 : f32 to vector<8x64xf32>
    %144 = arith.addf %143, %142 : vector<8x64xf32>
    %145 = arith.divf %143, %144 : vector<8x64xf32>
    %146 = arith.mulf %137, %93 : vector<8x64xf32>
    %147 = arith.mulf %136, %139 : vector<8x64xf32>
    %148 = arith.addf %146, %147 : vector<8x64xf32>
    %149 = math.tanh %148 : vector<8x64xf32>
    %150 = arith.mulf %145, %149 : vector<8x64xf32>
    %151 = vector.extract_strided_slice %150 {offsets = [0, 0], sizes = [8, 32], strides = [1, 1]} : vector<8x64xf32> to vector<8x32xf32>
    %152 = vector.extract_strided_slice %150 {offsets = [0, 32], sizes = [8, 32], strides = [1, 1]} : vector<8x64xf32> to vector<8x32xf32>
    %153 = tpu.concatenate %151, %152 in 0 : vector<8x32xf32>, vector<8x32xf32> -> vector<16x32xf32>
    %cst_49 = arith.constant dense<0.000000e+00> : vector<16x16xf32>
    %154 = tpu.matmul %153, %8, %cst_49 {dimension_numbers = #tpu.dot_dimension_numbers<[1], [0], [0], [1], [0, 0, 1, 1], [], []>} : vector<16x32xf32>, vector<32x16xf32>, vector<16x16xf32> -> vector<16x16xf32>
    %155 = arith.addf %154, %9 : vector<16x16xf32>
    %cst_50 = arith.constant dense<0xFF800000> : vector<16xf32>
    %156 = vector.multi_reduction <maximumf>, %155, %cst_50 [1] : vector<16x16xf32> to vector<16xf32>
    %157 = vector.shape_cast %156 : vector<16xf32> to vector<16x1xf32>
    %158 = vector.broadcast %157 : vector<16x1xf32> to vector<16x16xf32>
    %159 = arith.subf %155, %158 : vector<16x16xf32>
    %160 = math.exp %159 : vector<16x16xf32>
    %cst_51 = arith.constant dense<0.000000e+00> : vector<16xf32>
    %161 = vector.multi_reduction <add>, %160, %cst_51 [1] : vector<16x16xf32> to vector<16xf32>
    %162 = vector.shape_cast %161 : vector<16xf32> to vector<16x1xf32>
    %163 = tpu.reciprocal %162 {approx = true} : vector<16x1xf32> -> vector<16x1xf32>
    %164 = vector.broadcast %163 : vector<16x1xf32> to vector<16x16xf32>
    %165 = arith.mulf %160, %164 : vector<16x16xf32>
    %cst_52 = arith.constant dense<0.000000e+00> : vector<16x32xf32>
    %166 = tpu.matmul %165, %10, %cst_52 {dimension_numbers = #tpu.dot_dimension_numbers<[1], [0], [0], [1], [0, 0, 1, 1], [], []>} : vector<16x16xf32>, vector<16x32xf32>, vector<16x32xf32> -> vector<16x32xf32>
    %167 = arith.addf %166, %11 : vector<16x32xf32>
    %168 = vector.extract_strided_slice %167 {offsets = [0, 0], sizes = [8, 32], strides = [1, 1]} : vector<16x32xf32> to vector<8x32xf32>
    %169 = vector.extract_strided_slice %167 {offsets = [8, 0], sizes = [8, 32], strides = [1, 1]} : vector<16x32xf32> to vector<8x32xf32>
    %170 = arith.mulf %168, %169 : vector<8x32xf32>
    %171 = arith.index_cast %c2_i32 : i32 to index
    %c0_53 = arith.constant 0 : index
    %c0_54 = arith.constant 0 : index
    %172 = vector.load %arg9[%171, %c0_53, %c0_54] : memref<8x8x32xf32, #tpu.memory_space<vmem>>, vector<1x8x32xf32>
    %173 = vector.shape_cast %172 : vector<1x8x32xf32> to vector<8x32xf32>
    %174 = vector.shape_cast %170 : vector<8x32xf32> to vector<1x8x32xf32>
    tpu.vector_store %arg9[%171, %c0_53, %c0_54], %174 {strides = array<i32>} : memref<8x8x32xf32, #tpu.memory_space<vmem>>, vector<1x8x32xf32>,
    %175 = arith.index_cast %c2_i32 : i32 to index
    %c0_55 = arith.constant 0 : index
    %c0_56 = arith.constant 0 : index
    %176 = vector.load %arg10[%175, %c0_55, %c0_56] : memref<8x16x16xf32, #tpu.memory_space<vmem>>, vector<1x16x16xf32>
    %177 = vector.shape_cast %176 : vector<1x16x16xf32> to vector<16x16xf32>
    %178 = vector.shape_cast %165 : vector<16x16xf32> to vector<1x16x16xf32>
    tpu.vector_store %arg10[%175, %c0_55, %c0_56], %178 {strides = array<i32>} : memref<8x16x16xf32, #tpu.memory_space<vmem>>, vector<1x16x16xf32>,
    %c3_i32 = arith.constant 3 : i32
    %c8_i32_57 = arith.constant 8 : i32
    %179 = arith.muli %c3_i32, %c8_i32_57 : i32
    %180 = tpu.assume_multiple %179, 8 : i32
    %181 = arith.index_cast %180 : i32 to index
    %c0_58 = arith.constant 0 : index
    %182 = vector.load %arg11[%181, %c0_58] : memref<64x256xf32, #tpu.memory_space<vmem>>, vector<8x256xf32>
    %cst_59 = arith.constant dense<0.000000e+00> : vector<8x256xf32>
    %183 = tpu.matmul %170, %7, %cst_59 {dimension_numbers = #tpu.dot_dimension_numbers<[1], [0], [0], [1], [0, 0, 1, 1], [], []>} : vector<8x32xf32>, vector<32x256xf32>, vector<8x256xf32> -> vector<8x256xf32>
    %184 = arith.addf %182, %183 : vector<8x256xf32>
    %185 = vector.extract_strided_slice %184 {offsets = [0, 0], sizes = [8, 128], strides = [1, 1]} : vector<8x256xf32> to vector<8x128xf32>
    %186 = arith.negf %185 : vector<8x128xf32>
    %187 = math.exp %186 : vector<8x128xf32>
    %cst_60 = arith.constant 1.000000e+00 : f32
    %188 = vector.broadcast %cst_60 : f32 to vector<8x128xf32>
    %189 = arith.addf %188, %187 : vector<8x128xf32>
    %190 = arith.divf %188, %189 : vector<8x128xf32>
    %191 = vector.extract_strided_slice %190 {offsets = [0, 0], sizes = [8, 64], strides = [1, 1]} : vector<8x128xf32> to vector<8x64xf32>
    %192 = vector.extract_strided_slice %190 {offsets = [0, 64], sizes = [8, 64], strides = [1, 1]} : vector<8x128xf32> to vector<8x64xf32>
    %193 = vector.extract_strided_slice %184 {offsets = [0, 128], sizes = [8, 64], strides = [1, 1]} : vector<8x256xf32> to vector<8x64xf32>
    %194 = math.tanh %193 : vector<8x64xf32>
    %195 = vector.extract_strided_slice %184 {offsets = [0, 192], sizes = [8, 64], strides = [1, 1]} : vector<8x256xf32> to vector<8x64xf32>
    %196 = arith.negf %195 : vector<8x64xf32>
    %197 = math.exp %196 : vector<8x64xf32>
    %cst_61 = arith.constant 1.000000e+00 : f32
    %198 = vector.broadcast %cst_61 : f32 to vector<8x64xf32>
    %199 = arith.addf %198, %197 : vector<8x64xf32>
    %200 = arith.divf %198, %199 : vector<8x64xf32>
    %201 = arith.mulf %192, %148 : vector<8x64xf32>
    %202 = arith.mulf %191, %194 : vector<8x64xf32>
    %203 = arith.addf %201, %202 : vector<8x64xf32>
    %204 = math.tanh %203 : vector<8x64xf32>
    %205 = arith.mulf %200, %204 : vector<8x64xf32>
    %206 = vector.extract_strided_slice %205 {offsets = [0, 0], sizes = [8, 32], strides = [1, 1]} : vector<8x64xf32> to vector<8x32xf32>
    %207 = vector.extract_strided_slice %205 {offsets = [0, 32], sizes = [8, 32], strides = [1, 1]} : vector<8x64xf32> to vector<8x32xf32>
    %208 = tpu.concatenate %206, %207 in 0 : vector<8x32xf32>, vector<8x32xf32> -> vector<16x32xf32>
    %cst_62 = arith.constant dense<0.000000e+00> : vector<16x16xf32>
    %209 = tpu.matmul %208, %8, %cst_62 {dimension_numbers = #tpu.dot_dimension_numbers<[1], [0], [0], [1], [0, 0, 1, 1], [], []>} : vector<16x32xf32>, vector<32x16xf32>, vector<16x16xf32> -> vector<16x16xf32>
    %210 = arith.addf %209, %9 : vector<16x16xf32>
    %cst_63 = arith.constant dense<0xFF800000> : vector<16xf32>
    %211 = vector.multi_reduction <maximumf>, %210, %cst_63 [1] : vector<16x16xf32> to vector<16xf32>
    %212 = vector.shape_cast %211 : vector<16xf32> to vector<16x1xf32>
    %213 = vector.broadcast %212 : vector<16x1xf32> to vector<16x16xf32>
    %214 = arith.subf %210, %213 : vector<16x16xf32>
    %215 = math.exp %214 : vector<16x16xf32>
    %cst_64 = arith.constant dense<0.000000e+00> : vector<16xf32>
    %216 = vector.multi_reduction <add>, %215, %cst_64 [1] : vector<16x16xf32> to vector<16xf32>
    %217 = vector.shape_cast %216 : vector<16xf32> to vector<16x1xf32>
    %218 = tpu.reciprocal %217 {approx = true} : vector<16x1xf32> -> vector<16x1xf32>
    %219 = vector.broadcast %218 : vector<16x1xf32> to vector<16x16xf32>
    %220 = arith.mulf %215, %219 : vector<16x16xf32>
    %cst_65 = arith.constant dense<0.000000e+00> : vector<16x32xf32>
    %221 = tpu.matmul %220, %10, %cst_65 {dimension_numbers = #tpu.dot_dimension_numbers<[1], [0], [0], [1], [0, 0, 1, 1], [], []>} : vector<16x16xf32>, vector<16x32xf32>, vector<16x32xf32> -> vector<16x32xf32>
    %222 = arith.addf %221, %11 : vector<16x32xf32>
    %223 = vector.extract_strided_slice %222 {offsets = [0, 0], sizes = [8, 32], strides = [1, 1]} : vector<16x32xf32> to vector<8x32xf32>
    %224 = vector.extract_strided_slice %222 {offsets = [8, 0], sizes = [8, 32], strides = [1, 1]} : vector<16x32xf32> to vector<8x32xf32>
    %225 = arith.mulf %223, %224 : vector<8x32xf32>
    %226 = arith.index_cast %c3_i32 : i32 to index
    %c0_66 = arith.constant 0 : index
    %c0_67 = arith.constant 0 : index
    %227 = vector.load %arg9[%226, %c0_66, %c0_67] : memref<8x8x32xf32, #tpu.memory_space<vmem>>, vector<1x8x32xf32>
    %228 = vector.shape_cast %227 : vector<1x8x32xf32> to vector<8x32xf32>
    %229 = vector.shape_cast %225 : vector<8x32xf32> to vector<1x8x32xf32>
    tpu.vector_store %arg9[%226, %c0_66, %c0_67], %229 {strides = array<i32>} : memref<8x8x32xf32, #tpu.memory_space<vmem>>, vector<1x8x32xf32>,
    %230 = arith.index_cast %c3_i32 : i32 to index
    %c0_68 = arith.constant 0 : index
    %c0_69 = arith.constant 0 : index
    %231 = vector.load %arg10[%230, %c0_68, %c0_69] : memref<8x16x16xf32, #tpu.memory_space<vmem>>, vector<1x16x16xf32>
    %232 = vector.shape_cast %231 : vector<1x16x16xf32> to vector<16x16xf32>
    %233 = vector.shape_cast %220 : vector<16x16xf32> to vector<1x16x16xf32>
    tpu.vector_store %arg10[%230, %c0_68, %c0_69], %233 {strides = array<i32>} : memref<8x16x16xf32, #tpu.memory_space<vmem>>, vector<1x16x16xf32>,
    %c4_i32 = arith.constant 4 : i32
    %c8_i32_70 = arith.constant 8 : i32
    %234 = arith.muli %c4_i32, %c8_i32_70 : i32
    %235 = tpu.assume_multiple %234, 8 : i32
    %236 = arith.index_cast %235 : i32 to index
    %c0_71 = arith.constant 0 : index
    %237 = vector.load %arg11[%236, %c0_71] : memref<64x256xf32, #tpu.memory_space<vmem>>, vector<8x256xf32>
    %cst_72 = arith.constant dense<0.000000e+00> : vector<8x256xf32>
    %238 = tpu.matmul %225, %7, %cst_72 {dimension_numbers = #tpu.dot_dimension_numbers<[1], [0], [0], [1], [0, 0, 1, 1], [], []>} : vector<8x32xf32>, vector<32x256xf32>, vector<8x256xf32> -> vector<8x256xf32>
    %239 = arith.addf %237, %238 : vector<8x256xf32>
    %240 = vector.extract_strided_slice %239 {offsets = [0, 0], sizes = [8, 128], strides = [1, 1]} : vector<8x256xf32> to vector<8x128xf32>
    %241 = arith.negf %240 : vector<8x128xf32>
    %242 = math.exp %241 : vector<8x128xf32>
    %cst_73 = arith.constant 1.000000e+00 : f32
    %243 = vector.broadcast %cst_73 : f32 to vector<8x128xf32>
    %244 = arith.addf %243, %242 : vector<8x128xf32>
    %245 = arith.divf %243, %244 : vector<8x128xf32>
    %246 = vector.extract_strided_slice %245 {offsets = [0, 0], sizes = [8, 64], strides = [1, 1]} : vector<8x128xf32> to vector<8x64xf32>
    %247 = vector.extract_strided_slice %245 {offsets = [0, 64], sizes = [8, 64], strides = [1, 1]} : vector<8x128xf32> to vector<8x64xf32>
    %248 = vector.extract_strided_slice %239 {offsets = [0, 128], sizes = [8, 64], strides = [1, 1]} : vector<8x256xf32> to vector<8x64xf32>
    %249 = math.tanh %248 : vector<8x64xf32>
    %250 = vector.extract_strided_slice %239 {offsets = [0, 192], sizes = [8, 64], strides = [1, 1]} : vector<8x256xf32> to vector<8x64xf32>
    %251 = arith.negf %250 : vector<8x64xf32>
    %252 = math.exp %251 : vector<8x64xf32>
    %cst_74 = arith.constant 1.000000e+00 : f32
    %253 = vector.broadcast %cst_74 : f32 to vector<8x64xf32>
    %254 = arith.addf %253, %252 : vector<8x64xf32>
    %255 = arith.divf %253, %254 : vector<8x64xf32>
    %256 = arith.mulf %247, %203 : vector<8x64xf32>
    %257 = arith.mulf %246, %249 : vector<8x64xf32>
    %258 = arith.addf %256, %257 : vector<8x64xf32>
    %259 = math.tanh %258 : vector<8x64xf32>
    %260 = arith.mulf %255, %259 : vector<8x64xf32>
    %261 = vector.extract_strided_slice %260 {offsets = [0, 0], sizes = [8, 32], strides = [1, 1]} : vector<8x64xf32> to vector<8x32xf32>
    %262 = vector.extract_strided_slice %260 {offsets = [0, 32], sizes = [8, 32], strides = [1, 1]} : vector<8x64xf32> to vector<8x32xf32>
    %263 = tpu.concatenate %261, %262 in 0 : vector<8x32xf32>, vector<8x32xf32> -> vector<16x32xf32>
    %cst_75 = arith.constant dense<0.000000e+00> : vector<16x16xf32>
    %264 = tpu.matmul %263, %8, %cst_75 {dimension_numbers = #tpu.dot_dimension_numbers<[1], [0], [0], [1], [0, 0, 1, 1], [], []>} : vector<16x32xf32>, vector<32x16xf32>, vector<16x16xf32> -> vector<16x16xf32>
    %265 = arith.addf %264, %9 : vector<16x16xf32>
    %cst_76 = arith.constant dense<0xFF800000> : vector<16xf32>
    %266 = vector.multi_reduction <maximumf>, %265, %cst_76 [1] : vector<16x16xf32> to vector<16xf32>
    %267 = vector.shape_cast %266 : vector<16xf32> to vector<16x1xf32>
    %268 = vector.broadcast %267 : vector<16x1xf32> to vector<16x16xf32>
    %269 = arith.subf %265, %268 : vector<16x16xf32>
    %270 = math.exp %269 : vector<16x16xf32>
    %cst_77 = arith.constant dense<0.000000e+00> : vector<16xf32>
    %271 = vector.multi_reduction <add>, %270, %cst_77 [1] : vector<16x16xf32> to vector<16xf32>
    %272 = vector.shape_cast %271 : vector<16xf32> to vector<16x1xf32>
    %273 = tpu.reciprocal %272 {approx = true} : vector<16x1xf32> -> vector<16x1xf32>
    %274 = vector.broadcast %273 : vector<16x1xf32> to vector<16x16xf32>
    %275 = arith.mulf %270, %274 : vector<16x16xf32>
    %cst_78 = arith.constant dense<0.000000e+00> : vector<16x32xf32>
    %276 = tpu.matmul %275, %10, %cst_78 {dimension_numbers = #tpu.dot_dimension_numbers<[1], [0], [0], [1], [0, 0, 1, 1], [], []>} : vector<16x16xf32>, vector<16x32xf32>, vector<16x32xf32> -> vector<16x32xf32>
    %277 = arith.addf %276, %11 : vector<16x32xf32>
    %278 = vector.extract_strided_slice %277 {offsets = [0, 0], sizes = [8, 32], strides = [1, 1]} : vector<16x32xf32> to vector<8x32xf32>
    %279 = vector.extract_strided_slice %277 {offsets = [8, 0], sizes = [8, 32], strides = [1, 1]} : vector<16x32xf32> to vector<8x32xf32>
    %280 = arith.mulf %278, %279 : vector<8x32xf32>
    %281 = arith.index_cast %c4_i32 : i32 to index
    %c0_79 = arith.constant 0 : index
    %c0_80 = arith.constant 0 : index
    %282 = vector.load %arg9[%281, %c0_79, %c0_80] : memref<8x8x32xf32, #tpu.memory_space<vmem>>, vector<1x8x32xf32>
    %283 = vector.shape_cast %282 : vector<1x8x32xf32> to vector<8x32xf32>
    %284 = vector.shape_cast %280 : vector<8x32xf32> to vector<1x8x32xf32>
    tpu.vector_store %arg9[%281, %c0_79, %c0_80], %284 {strides = array<i32>} : memref<8x8x32xf32, #tpu.memory_space<vmem>>, vector<1x8x32xf32>,
    %285 = arith.index_cast %c4_i32 : i32 to index
    %c0_81 = arith.constant 0 : index
    %c0_82 = arith.constant 0 : index
    %286 = vector.load %arg10[%285, %c0_81, %c0_82] : memref<8x16x16xf32, #tpu.memory_space<vmem>>, vector<1x16x16xf32>
    %287 = vector.shape_cast %286 : vector<1x16x16xf32> to vector<16x16xf32>
    %288 = vector.shape_cast %275 : vector<16x16xf32> to vector<1x16x16xf32>
    tpu.vector_store %arg10[%285, %c0_81, %c0_82], %288 {strides = array<i32>} : memref<8x16x16xf32, #tpu.memory_space<vmem>>, vector<1x16x16xf32>,
    %c5_i32 = arith.constant 5 : i32
    %c8_i32_83 = arith.constant 8 : i32
    %289 = arith.muli %c5_i32, %c8_i32_83 : i32
    %290 = tpu.assume_multiple %289, 8 : i32
    %291 = arith.index_cast %290 : i32 to index
    %c0_84 = arith.constant 0 : index
    %292 = vector.load %arg11[%291, %c0_84] : memref<64x256xf32, #tpu.memory_space<vmem>>, vector<8x256xf32>
    %cst_85 = arith.constant dense<0.000000e+00> : vector<8x256xf32>
    %293 = tpu.matmul %280, %7, %cst_85 {dimension_numbers = #tpu.dot_dimension_numbers<[1], [0], [0], [1], [0, 0, 1, 1], [], []>} : vector<8x32xf32>, vector<32x256xf32>, vector<8x256xf32> -> vector<8x256xf32>
    %294 = arith.addf %292, %293 : vector<8x256xf32>
    %295 = vector.extract_strided_slice %294 {offsets = [0, 0], sizes = [8, 128], strides = [1, 1]} : vector<8x256xf32> to vector<8x128xf32>
    %296 = arith.negf %295 : vector<8x128xf32>
    %297 = math.exp %296 : vector<8x128xf32>
    %cst_86 = arith.constant 1.000000e+00 : f32
    %298 = vector.broadcast %cst_86 : f32 to vector<8x128xf32>
    %299 = arith.addf %298, %297 : vector<8x128xf32>
    %300 = arith.divf %298, %299 : vector<8x128xf32>
    %301 = vector.extract_strided_slice %300 {offsets = [0, 0], sizes = [8, 64], strides = [1, 1]} : vector<8x128xf32> to vector<8x64xf32>
    %302 = vector.extract_strided_slice %300 {offsets = [0, 64], sizes = [8, 64], strides = [1, 1]} : vector<8x128xf32> to vector<8x64xf32>
    %303 = vector.extract_strided_slice %294 {offsets = [0, 128], sizes = [8, 64], strides = [1, 1]} : vector<8x256xf32> to vector<8x64xf32>
    %304 = math.tanh %303 : vector<8x64xf32>
    %305 = vector.extract_strided_slice %294 {offsets = [0, 192], sizes = [8, 64], strides = [1, 1]} : vector<8x256xf32> to vector<8x64xf32>
    %306 = arith.negf %305 : vector<8x64xf32>
    %307 = math.exp %306 : vector<8x64xf32>
    %cst_87 = arith.constant 1.000000e+00 : f32
    %308 = vector.broadcast %cst_87 : f32 to vector<8x64xf32>
    %309 = arith.addf %308, %307 : vector<8x64xf32>
    %310 = arith.divf %308, %309 : vector<8x64xf32>
    %311 = arith.mulf %302, %258 : vector<8x64xf32>
    %312 = arith.mulf %301, %304 : vector<8x64xf32>
    %313 = arith.addf %311, %312 : vector<8x64xf32>
    %314 = math.tanh %313 : vector<8x64xf32>
    %315 = arith.mulf %310, %314 : vector<8x64xf32>
    %316 = vector.extract_strided_slice %315 {offsets = [0, 0], sizes = [8, 32], strides = [1, 1]} : vector<8x64xf32> to vector<8x32xf32>
    %317 = vector.extract_strided_slice %315 {offsets = [0, 32], sizes = [8, 32], strides = [1, 1]} : vector<8x64xf32> to vector<8x32xf32>
    %318 = tpu.concatenate %316, %317 in 0 : vector<8x32xf32>, vector<8x32xf32> -> vector<16x32xf32>
    %cst_88 = arith.constant dense<0.000000e+00> : vector<16x16xf32>
    %319 = tpu.matmul %318, %8, %cst_88 {dimension_numbers = #tpu.dot_dimension_numbers<[1], [0], [0], [1], [0, 0, 1, 1], [], []>} : vector<16x32xf32>, vector<32x16xf32>, vector<16x16xf32> -> vector<16x16xf32>
    %320 = arith.addf %319, %9 : vector<16x16xf32>
    %cst_89 = arith.constant dense<0xFF800000> : vector<16xf32>
    %321 = vector.multi_reduction <maximumf>, %320, %cst_89 [1] : vector<16x16xf32> to vector<16xf32>
    %322 = vector.shape_cast %321 : vector<16xf32> to vector<16x1xf32>
    %323 = vector.broadcast %322 : vector<16x1xf32> to vector<16x16xf32>
    %324 = arith.subf %320, %323 : vector<16x16xf32>
    %325 = math.exp %324 : vector<16x16xf32>
    %cst_90 = arith.constant dense<0.000000e+00> : vector<16xf32>
    %326 = vector.multi_reduction <add>, %325, %cst_90 [1] : vector<16x16xf32> to vector<16xf32>
    %327 = vector.shape_cast %326 : vector<16xf32> to vector<16x1xf32>
    %328 = tpu.reciprocal %327 {approx = true} : vector<16x1xf32> -> vector<16x1xf32>
    %329 = vector.broadcast %328 : vector<16x1xf32> to vector<16x16xf32>
    %330 = arith.mulf %325, %329 : vector<16x16xf32>
    %cst_91 = arith.constant dense<0.000000e+00> : vector<16x32xf32>
    %331 = tpu.matmul %330, %10, %cst_91 {dimension_numbers = #tpu.dot_dimension_numbers<[1], [0], [0], [1], [0, 0, 1, 1], [], []>} : vector<16x16xf32>, vector<16x32xf32>, vector<16x32xf32> -> vector<16x32xf32>
    %332 = arith.addf %331, %11 : vector<16x32xf32>
    %333 = vector.extract_strided_slice %332 {offsets = [0, 0], sizes = [8, 32], strides = [1, 1]} : vector<16x32xf32> to vector<8x32xf32>
    %334 = vector.extract_strided_slice %332 {offsets = [8, 0], sizes = [8, 32], strides = [1, 1]} : vector<16x32xf32> to vector<8x32xf32>
    %335 = arith.mulf %333, %334 : vector<8x32xf32>
    %336 = arith.index_cast %c5_i32 : i32 to index
    %c0_92 = arith.constant 0 : index
    %c0_93 = arith.constant 0 : index
    %337 = vector.load %arg9[%336, %c0_92, %c0_93] : memref<8x8x32xf32, #tpu.memory_space<vmem>>, vector<1x8x32xf32>
    %338 = vector.shape_cast %337 : vector<1x8x32xf32> to vector<8x32xf32>
    %339 = vector.shape_cast %335 : vector<8x32xf32> to vector<1x8x32xf32>
    tpu.vector_store %arg9[%336, %c0_92, %c0_93], %339 {strides = array<i32>} : memref<8x8x32xf32, #tpu.memory_space<vmem>>, vector<1x8x32xf32>,
    %340 = arith.index_cast %c5_i32 : i32 to index
    %c0_94 = arith.constant 0 : index
    %c0_95 = arith.constant 0 : index
    %341 = vector.load %arg10[%340, %c0_94, %c0_95] : memref<8x16x16xf32, #tpu.memory_space<vmem>>, vector<1x16x16xf32>
    %342 = vector.shape_cast %341 : vector<1x16x16xf32> to vector<16x16xf32>
    %343 = vector.shape_cast %330 : vector<16x16xf32> to vector<1x16x16xf32>
    tpu.vector_store %arg10[%340, %c0_94, %c0_95], %343 {strides = array<i32>} : memref<8x16x16xf32, #tpu.memory_space<vmem>>, vector<1x16x16xf32>,
    %c6_i32 = arith.constant 6 : i32
    %c8_i32_96 = arith.constant 8 : i32
    %344 = arith.muli %c6_i32, %c8_i32_96 : i32
    %345 = tpu.assume_multiple %344, 8 : i32
    %346 = arith.index_cast %345 : i32 to index
    %c0_97 = arith.constant 0 : index
    %347 = vector.load %arg11[%346, %c0_97] : memref<64x256xf32, #tpu.memory_space<vmem>>, vector<8x256xf32>
    %cst_98 = arith.constant dense<0.000000e+00> : vector<8x256xf32>
    %348 = tpu.matmul %335, %7, %cst_98 {dimension_numbers = #tpu.dot_dimension_numbers<[1], [0], [0], [1], [0, 0, 1, 1], [], []>} : vector<8x32xf32>, vector<32x256xf32>, vector<8x256xf32> -> vector<8x256xf32>
    %349 = arith.addf %347, %348 : vector<8x256xf32>
    %350 = vector.extract_strided_slice %349 {offsets = [0, 0], sizes = [8, 128], strides = [1, 1]} : vector<8x256xf32> to vector<8x128xf32>
    %351 = arith.negf %350 : vector<8x128xf32>
    %352 = math.exp %351 : vector<8x128xf32>
    %cst_99 = arith.constant 1.000000e+00 : f32
    %353 = vector.broadcast %cst_99 : f32 to vector<8x128xf32>
    %354 = arith.addf %353, %352 : vector<8x128xf32>
    %355 = arith.divf %353, %354 : vector<8x128xf32>
    %356 = vector.extract_strided_slice %355 {offsets = [0, 0], sizes = [8, 64], strides = [1, 1]} : vector<8x128xf32> to vector<8x64xf32>
    %357 = vector.extract_strided_slice %355 {offsets = [0, 64], sizes = [8, 64], strides = [1, 1]} : vector<8x128xf32> to vector<8x64xf32>
    %358 = vector.extract_strided_slice %349 {offsets = [0, 128], sizes = [8, 64], strides = [1, 1]} : vector<8x256xf32> to vector<8x64xf32>
    %359 = math.tanh %358 : vector<8x64xf32>
    %360 = vector.extract_strided_slice %349 {offsets = [0, 192], sizes = [8, 64], strides = [1, 1]} : vector<8x256xf32> to vector<8x64xf32>
    %361 = arith.negf %360 : vector<8x64xf32>
    %362 = math.exp %361 : vector<8x64xf32>
    %cst_100 = arith.constant 1.000000e+00 : f32
    %363 = vector.broadcast %cst_100 : f32 to vector<8x64xf32>
    %364 = arith.addf %363, %362 : vector<8x64xf32>
    %365 = arith.divf %363, %364 : vector<8x64xf32>
    %366 = arith.mulf %357, %313 : vector<8x64xf32>
    %367 = arith.mulf %356, %359 : vector<8x64xf32>
    %368 = arith.addf %366, %367 : vector<8x64xf32>
    %369 = math.tanh %368 : vector<8x64xf32>
    %370 = arith.mulf %365, %369 : vector<8x64xf32>
    %371 = vector.extract_strided_slice %370 {offsets = [0, 0], sizes = [8, 32], strides = [1, 1]} : vector<8x64xf32> to vector<8x32xf32>
    %372 = vector.extract_strided_slice %370 {offsets = [0, 32], sizes = [8, 32], strides = [1, 1]} : vector<8x64xf32> to vector<8x32xf32>
    %373 = tpu.concatenate %371, %372 in 0 : vector<8x32xf32>, vector<8x32xf32> -> vector<16x32xf32>
    %cst_101 = arith.constant dense<0.000000e+00> : vector<16x16xf32>
    %374 = tpu.matmul %373, %8, %cst_101 {dimension_numbers = #tpu.dot_dimension_numbers<[1], [0], [0], [1], [0, 0, 1, 1], [], []>} : vector<16x32xf32>, vector<32x16xf32>, vector<16x16xf32> -> vector<16x16xf32>
    %375 = arith.addf %374, %9 : vector<16x16xf32>
    %cst_102 = arith.constant dense<0xFF800000> : vector<16xf32>
    %376 = vector.multi_reduction <maximumf>, %375, %cst_102 [1] : vector<16x16xf32> to vector<16xf32>
    %377 = vector.shape_cast %376 : vector<16xf32> to vector<16x1xf32>
    %378 = vector.broadcast %377 : vector<16x1xf32> to vector<16x16xf32>
    %379 = arith.subf %375, %378 : vector<16x16xf32>
    %380 = math.exp %379 : vector<16x16xf32>
    %cst_103 = arith.constant dense<0.000000e+00> : vector<16xf32>
    %381 = vector.multi_reduction <add>, %380, %cst_103 [1] : vector<16x16xf32> to vector<16xf32>
    %382 = vector.shape_cast %381 : vector<16xf32> to vector<16x1xf32>
    %383 = tpu.reciprocal %382 {approx = true} : vector<16x1xf32> -> vector<16x1xf32>
    %384 = vector.broadcast %383 : vector<16x1xf32> to vector<16x16xf32>
    %385 = arith.mulf %380, %384 : vector<16x16xf32>
    %cst_104 = arith.constant dense<0.000000e+00> : vector<16x32xf32>
    %386 = tpu.matmul %385, %10, %cst_104 {dimension_numbers = #tpu.dot_dimension_numbers<[1], [0], [0], [1], [0, 0, 1, 1], [], []>} : vector<16x16xf32>, vector<16x32xf32>, vector<16x32xf32> -> vector<16x32xf32>
    %387 = arith.addf %386, %11 : vector<16x32xf32>
    %388 = vector.extract_strided_slice %387 {offsets = [0, 0], sizes = [8, 32], strides = [1, 1]} : vector<16x32xf32> to vector<8x32xf32>
    %389 = vector.extract_strided_slice %387 {offsets = [8, 0], sizes = [8, 32], strides = [1, 1]} : vector<16x32xf32> to vector<8x32xf32>
    %390 = arith.mulf %388, %389 : vector<8x32xf32>
    %391 = arith.index_cast %c6_i32 : i32 to index
    %c0_105 = arith.constant 0 : index
    %c0_106 = arith.constant 0 : index
    %392 = vector.load %arg9[%391, %c0_105, %c0_106] : memref<8x8x32xf32, #tpu.memory_space<vmem>>, vector<1x8x32xf32>
    %393 = vector.shape_cast %392 : vector<1x8x32xf32> to vector<8x32xf32>
    %394 = vector.shape_cast %390 : vector<8x32xf32> to vector<1x8x32xf32>
    tpu.vector_store %arg9[%391, %c0_105, %c0_106], %394 {strides = array<i32>} : memref<8x8x32xf32, #tpu.memory_space<vmem>>, vector<1x8x32xf32>,
    %395 = arith.index_cast %c6_i32 : i32 to index
    %c0_107 = arith.constant 0 : index
    %c0_108 = arith.constant 0 : index
    %396 = vector.load %arg10[%395, %c0_107, %c0_108] : memref<8x16x16xf32, #tpu.memory_space<vmem>>, vector<1x16x16xf32>
    %397 = vector.shape_cast %396 : vector<1x16x16xf32> to vector<16x16xf32>
    %398 = vector.shape_cast %385 : vector<16x16xf32> to vector<1x16x16xf32>
    tpu.vector_store %arg10[%395, %c0_107, %c0_108], %398 {strides = array<i32>} : memref<8x16x16xf32, #tpu.memory_space<vmem>>, vector<1x16x16xf32>,
    %c7_i32 = arith.constant 7 : i32
    %c8_i32_109 = arith.constant 8 : i32
    %399 = arith.muli %c7_i32, %c8_i32_109 : i32
    %400 = tpu.assume_multiple %399, 8 : i32
    %401 = arith.index_cast %400 : i32 to index
    %c0_110 = arith.constant 0 : index
    %402 = vector.load %arg11[%401, %c0_110] : memref<64x256xf32, #tpu.memory_space<vmem>>, vector<8x256xf32>
    %cst_111 = arith.constant dense<0.000000e+00> : vector<8x256xf32>
    %403 = tpu.matmul %390, %7, %cst_111 {dimension_numbers = #tpu.dot_dimension_numbers<[1], [0], [0], [1], [0, 0, 1, 1], [], []>} : vector<8x32xf32>, vector<32x256xf32>, vector<8x256xf32> -> vector<8x256xf32>
    %404 = arith.addf %402, %403 : vector<8x256xf32>
    %405 = vector.extract_strided_slice %404 {offsets = [0, 0], sizes = [8, 128], strides = [1, 1]} : vector<8x256xf32> to vector<8x128xf32>
    %406 = arith.negf %405 : vector<8x128xf32>
    %407 = math.exp %406 : vector<8x128xf32>
    %cst_112 = arith.constant 1.000000e+00 : f32
    %408 = vector.broadcast %cst_112 : f32 to vector<8x128xf32>
    %409 = arith.addf %408, %407 : vector<8x128xf32>
    %410 = arith.divf %408, %409 : vector<8x128xf32>
    %411 = vector.extract_strided_slice %410 {offsets = [0, 0], sizes = [8, 64], strides = [1, 1]} : vector<8x128xf32> to vector<8x64xf32>
    %412 = vector.extract_strided_slice %410 {offsets = [0, 64], sizes = [8, 64], strides = [1, 1]} : vector<8x128xf32> to vector<8x64xf32>
    %413 = vector.extract_strided_slice %404 {offsets = [0, 128], sizes = [8, 64], strides = [1, 1]} : vector<8x256xf32> to vector<8x64xf32>
    %414 = math.tanh %413 : vector<8x64xf32>
    %415 = vector.extract_strided_slice %404 {offsets = [0, 192], sizes = [8, 64], strides = [1, 1]} : vector<8x256xf32> to vector<8x64xf32>
    %416 = arith.negf %415 : vector<8x64xf32>
    %417 = math.exp %416 : vector<8x64xf32>
    %cst_113 = arith.constant 1.000000e+00 : f32
    %418 = vector.broadcast %cst_113 : f32 to vector<8x64xf32>
    %419 = arith.addf %418, %417 : vector<8x64xf32>
    %420 = arith.divf %418, %419 : vector<8x64xf32>
    %421 = arith.mulf %412, %368 : vector<8x64xf32>
    %422 = arith.mulf %411, %414 : vector<8x64xf32>
    %423 = arith.addf %421, %422 : vector<8x64xf32>
    %424 = math.tanh %423 : vector<8x64xf32>
    %425 = arith.mulf %420, %424 : vector<8x64xf32>
    %426 = vector.extract_strided_slice %425 {offsets = [0, 0], sizes = [8, 32], strides = [1, 1]} : vector<8x64xf32> to vector<8x32xf32>
    %427 = vector.extract_strided_slice %425 {offsets = [0, 32], sizes = [8, 32], strides = [1, 1]} : vector<8x64xf32> to vector<8x32xf32>
    %428 = tpu.concatenate %426, %427 in 0 : vector<8x32xf32>, vector<8x32xf32> -> vector<16x32xf32>
    %cst_114 = arith.constant dense<0.000000e+00> : vector<16x16xf32>
    %429 = tpu.matmul %428, %8, %cst_114 {dimension_numbers = #tpu.dot_dimension_numbers<[1], [0], [0], [1], [0, 0, 1, 1], [], []>} : vector<16x32xf32>, vector<32x16xf32>, vector<16x16xf32> -> vector<16x16xf32>
    %430 = arith.addf %429, %9 : vector<16x16xf32>
    %cst_115 = arith.constant dense<0xFF800000> : vector<16xf32>
    %431 = vector.multi_reduction <maximumf>, %430, %cst_115 [1] : vector<16x16xf32> to vector<16xf32>
    %432 = vector.shape_cast %431 : vector<16xf32> to vector<16x1xf32>
    %433 = vector.broadcast %432 : vector<16x1xf32> to vector<16x16xf32>
    %434 = arith.subf %430, %433 : vector<16x16xf32>
    %435 = math.exp %434 : vector<16x16xf32>
    %cst_116 = arith.constant dense<0.000000e+00> : vector<16xf32>
    %436 = vector.multi_reduction <add>, %435, %cst_116 [1] : vector<16x16xf32> to vector<16xf32>
    %437 = vector.shape_cast %436 : vector<16xf32> to vector<16x1xf32>
    %438 = tpu.reciprocal %437 {approx = true} : vector<16x1xf32> -> vector<16x1xf32>
    %439 = vector.broadcast %438 : vector<16x1xf32> to vector<16x16xf32>
    %440 = arith.mulf %435, %439 : vector<16x16xf32>
    %cst_117 = arith.constant dense<0.000000e+00> : vector<16x32xf32>
    %441 = tpu.matmul %440, %10, %cst_117 {dimension_numbers = #tpu.dot_dimension_numbers<[1], [0], [0], [1], [0, 0, 1, 1], [], []>} : vector<16x16xf32>, vector<16x32xf32>, vector<16x32xf32> -> vector<16x32xf32>
    %442 = arith.addf %441, %11 : vector<16x32xf32>
    %443 = vector.extract_strided_slice %442 {offsets = [0, 0], sizes = [8, 32], strides = [1, 1]} : vector<16x32xf32> to vector<8x32xf32>
    %444 = vector.extract_strided_slice %442 {offsets = [8, 0], sizes = [8, 32], strides = [1, 1]} : vector<16x32xf32> to vector<8x32xf32>
    %445 = arith.mulf %443, %444 : vector<8x32xf32>
    %446 = arith.index_cast %c7_i32 : i32 to index
    %c0_118 = arith.constant 0 : index
    %c0_119 = arith.constant 0 : index
    %447 = vector.load %arg9[%446, %c0_118, %c0_119] : memref<8x8x32xf32, #tpu.memory_space<vmem>>, vector<1x8x32xf32>
    %448 = vector.shape_cast %447 : vector<1x8x32xf32> to vector<8x32xf32>
    %449 = vector.shape_cast %445 : vector<8x32xf32> to vector<1x8x32xf32>
    tpu.vector_store %arg9[%446, %c0_118, %c0_119], %449 {strides = array<i32>} : memref<8x8x32xf32, #tpu.memory_space<vmem>>, vector<1x8x32xf32>,
    %450 = arith.index_cast %c7_i32 : i32 to index
    %c0_120 = arith.constant 0 : index
    %c0_121 = arith.constant 0 : index
    %451 = vector.load %arg10[%450, %c0_120, %c0_121] : memref<8x16x16xf32, #tpu.memory_space<vmem>>, vector<1x16x16xf32>
    %452 = vector.shape_cast %451 : vector<1x16x16xf32> to vector<16x16xf32>
    %453 = vector.shape_cast %440 : vector<16x16xf32> to vector<1x16x16xf32>
    tpu.vector_store %arg10[%450, %c0_120, %c0_121], %453 {strides = array<i32>} : memref<8x16x16xf32, #tpu.memory_space<vmem>>, vector<1x16x16xf32>,
    %c8_i32_122 = arith.constant 8 : i32
    return
  }
  func.func @transform_0(%arg0: i32) -> (i32, i32) {
    %c0_i32 = arith.constant 0 : i32
    %c0_i32_0 = arith.constant 0 : i32
    %c0_i32_1 = arith.constant 0 : i32
    return %c0_i32, %c0_i32_0 : i32, i32
  }
  func.func @transform_1(%arg0: i32) -> (i32, i32) {
    %c0_i32 = arith.constant 0 : i32
    %c0_i32_0 = arith.constant 0 : i32
    %c0_i32_1 = arith.constant 0 : i32
    return %c0_i32, %c0_i32_0 : i32, i32
  }
  func.func @transform_2(%arg0: i32) -> (i32, i32) {
    %c0_i32 = arith.constant 0 : i32
    %c0_i32_0 = arith.constant 0 : i32
    %c0_i32_1 = arith.constant 0 : i32
    return %c0_i32, %c0_i32_0 : i32, i32
  }
  func.func @transform_3(%arg0: i32) -> (i32, i32) {
    %c0_i32 = arith.constant 0 : i32
    %c0_i32_0 = arith.constant 0 : i32
    %c0_i32_1 = arith.constant 0 : i32
    return %c0_i32, %c0_i32_0 : i32, i32
  }
  func.func @transform_4(%arg0: i32) -> (i32, i32) {
    %c0_i32 = arith.constant 0 : i32
    %c0_i32_0 = arith.constant 0 : i32
    %c0_i32_1 = arith.constant 0 : i32
    return %c0_i32, %c0_i32_0 : i32, i32
  }
  func.func @transform_5(%arg0: i32) -> (i32, i32) {
    %c0_i32 = arith.constant 0 : i32
    %c0_i32_0 = arith.constant 0 : i32
    %c0_i32_1 = arith.constant 0 : i32
    return %c0_i32, %c0_i32_0 : i32, i32
  }
  func.func @transform_6(%arg0: i32) -> (i32, i32) {
    %c0_i32 = arith.constant 0 : i32
    %c0_i32_0 = arith.constant 0 : i32
    %c0_i32_1 = arith.constant 0 : i32
    return %c0_i32, %c0_i32_0 : i32, i32
  }
  func.func @transform_7(%arg0: i32) -> (i32, i32) {
    %c0_i32 = arith.constant 0 : i32
    %c0_i32_0 = arith.constant 0 : i32
    %c0_i32_1 = arith.constant 0 : i32
    return %c0_i32, %c0_i32_0 : i32, i32
  }
  func.func @transform_8(%arg0: i32) -> (i32, i32, i32) {
    %c0_i32 = arith.constant 0 : i32
    %c0_i32_0 = arith.constant 0 : i32
    %c0_i32_1 = arith.constant 0 : i32
    %c0_i32_2 = arith.constant 0 : i32
    return %c0_i32, %c0_i32_0, %c0_i32_1 : i32, i32, i32
  }
  func.func @transform_9(%arg0: i32) -> (i32, i32, i32) {
    %c0_i32 = arith.constant 0 : i32
    %c0_i32_0 = arith.constant 0 : i32
    %c0_i32_1 = arith.constant 0 : i32
    %c0_i32_2 = arith.constant 0 : i32
    return %c0_i32, %c0_i32_0, %c0_i32_1 : i32, i32, i32
  }
}

</mosaic_0001>

<bundles_post_ra>
// kernel: tpu_custom_call.1
= control target key start
LH: loop header
LB: loop body
LE: loop exit
PB: predicated region body
PF: predicated region fallthrough
CT: control target
= control target key end

     0   :  { %15 = vsyncpa [#allocation4], 0  ;;  %v3353_v5 = vmov 0.0   ;;  %vm57_vm0 = vcmask 130048   ;;  %s3881_s0 = inlined_call_operand.vmem [shape: f32[64,16], index: 0, kind: input, shape index: {}]   ;;  %s3882_s1 = inlined_call_operand.vmem [shape: f32[16,256], index: 1, kind: input, shape index: {}]   ;;  %s3883_s2 = inlined_call_operand.vmem [shape: f32[32,256], index: 2, kind: input, shape index: {}]   ;;  %s3884_s3 = inlined_call_operand.vmem [shape: f32[1,256], index: 3, kind: input, shape index: {}]   ;;  %s3885_s4 = inlined_call_operand.vmem [shape: f32[32,16], index: 4, kind: input, shape index: {}]   ;;  %s3886_s5 = inlined_call_operand.vmem [shape: f32[16,16], index: 5, kind: input, shape index: {}]   ;;  %s3887_s6 = inlined_call_operand.vmem [shape: f32[16,32], index: 6, kind: input, shape index: {}]   ;;  %s3888_s7 = inlined_call_operand.vmem [shape: f32[16,32], index: 7, kind: input, shape index: {}]   ;;  %s3889_s8 = inlined_call_operand.hbm [shape: f32[8,8,32], index: 8, kind: output, shape index: {0}]   ;;  %s3890_s9 = inlined_call_operand.hbm [shape: f32[8,16,16], index: 9, kind: output, shape index: {1}]  }
   0x1   :  { %v42_v0 = vld [vmem:[%s3882_s1 + $0x8] sm:$0xff]  ;;  %v44_v1 = vld [vmem:[%s3882_s1 + $0x18] sm:$0xff]  ;;  %v41_v2 = vld [vmem:[%s3882_s1] sm:$0xff]  ;;  %146 = vmatprep.mubr.f32.mxu0 %v3353_v5 }
   0x2   :  { %v2938_v3 = vpack.c.bf16 %v44_v1, %v42_v0  ;;  %v43_v4 = vld [vmem:[%s3882_s1 + $0x10] sm:$0xff]  ;;  %v212_v6 = vld [vmem:[%s3883_s2 + $0x8] sm:$0xff]  ;;  %v214_v8 = vld [vmem:[%s3883_s2 + $0x18] sm:$0xff] }
   0x3   :  { %v2940_v7 = vpack.c.bf16 %v43_v4, %v41_v2  ;;  %v211_v9 = vld [vmem:[%s3883_s2] sm:$0xff]  ;;  %v213_v10 = vld [vmem:[%s3883_s2 + $0x10] sm:$0xff]  ;;  %v3435_v11 = vpack.c.bf16 %v214_v8, %v212_v6  ;;  %v216_v14 = vld [vmem:[%s3883_s2 + $0x28] sm:$0xff] }
   0x4   :  { %2939 = vmatprep.subr.bf16.mxu0 %v2938_v3  ;;  %v33_v12 = vld [vmem:[%s3881_s0] sm:$0xff]  ;;  %v3440_v13 = vpack.c.bf16 %v213_v10, %v211_v9  ;;  %v218_v15 = vld [vmem:[%s3883_s2 + $0x38] sm:$0xff]  ;;  %v217_v18 = vld [vmem:[%s3883_s2 + $0x30] sm:$0xff] }
   0x5   :  { %2941 = vmatpush1.bf16.msra.mxu0 %v2940_v7  ;;  %v3449_v16 = vpack.c.bf16 %v218_v15, %v216_v14  ;;  %v215_v17 = vld [vmem:[%s3883_s2 + $0x20] sm:$0xff] }
   0x6   :  { %2943 = vmatprep.subr.bf16.mxu0 %v3435_v11 }
   0x8   :  { %2651 = vmatmul.mubr.msk.f32.vlgmr.msra.gmra.mrb[0].mxu0 %vm57_vm0, %v33_v12 }
   0x9   :  { %16 = vsyncpa [#allocation6], 0  ;;  %2945 = vmatpush1.bf16.msra.mxu0 %v3440_v13  ;;  %152 = vmatprep.mubr.f32.mxu0 %v3353_v5  ;;  %v34_v19 = vld [vmem:[%s3881_s0 + $0x8] sm:$0xff]  ;;  %v3463_v20 = vpack.c.bf16 %v217_v18, %v215_v17  ;;  %v35_v21 = vld [vmem:[%s3881_s0 + $0x10] sm:$0xff]  ;;  %v47_v27 = vlaneseq  ;;  %s3355_s13 = smov 96   ;;  %vm234_vm1 = vcmask 261120  }
   0xa   :  { %2947 = vmatprep.subr.bf16.mxu0 %v3449_v16  ;;  %v36_v22 = vld [vmem:[%s3881_s0 + $0x18] sm:$0xff]  ;;  %v37_v23 = vld [vmem:[%s3881_s0 + $0x20] sm:$0xff]  ;;  %v38_v24 = vld [vmem:[%s3881_s0 + $0x28] sm:$0xff] }
   0xb   :  { %v39_v25 = vld [vmem:[%s3881_s0 + $0x30] sm:$0xff]  ;;  %v40_v26 = vld [vmem:[%s3881_s0 + $0x38] sm:$0xff]  ;;  %v48_v28 = vshrl.u32 %v47_v27, 7  ;;  %v45_v30 = vld [vmem:[%s3884_s3] sm:$0x3]  ;;  %s3354_s3 = smov 64  }
   0xc   :  { %2652 = vmatmul.mubr.msk.f32.gmra.mrb[2].mxu0 %vm57_vm0, %v34_v19  ;;  %v219_v50 = vld [vmem:[%s3885_s4] sm:$0xff]  ;;  %v220_v51 = vld [vmem:[%s3885_s4 + $0x8] sm:$0xff]  ;;  %v221_v52 = vld [vmem:[%s3885_s4 + $0x10] sm:$0xff] }
   0xd   :  { %158 = vmatprep.mubr.f32.mxu0 %v3353_v5  ;;  %2949 = vmatpush1.bf16.msra.mxu0 %v3463_v20  ;;  %v49_v29 = vsub.s32 0, %v48_v28  ;;  %v53_v36 = vsub.s32 1, %v48_v28  ;;  %v3528_v53 = vpack.c.bf16 %v220_v51, %v219_v50  ;;  %v222_v54 = vld [vmem:[%s3885_s4 + $0x18] sm:$0xff]  ;;  %v3547_v62 = vld [vmem:[%s3886_s5 + $0x8] sm:$0xff]  ;;  %v3552_v63 = vld [vmem:[%s3886_s5] sm:$0xff] }
   0xe   :  { %2963 = vmatprep.subr.bf16.mxu0 %v3435_v11  ;;  %v3533_v55 = vpack.c.bf16 %v222_v54, %v221_v52 }
   0xf   :  { %v3509_v31 = vrot.slane %v45_v30, %v49_v29  ;;  %v3512_v37 = vrot.slane %v45_v30, %v53_v36  ;;  %2951 = vmatprep.subr.bf16.mxu1 %v3528_v53  ;;  %v3582_v30 = vld [vmem:[%s3888_s7 + $0x8] sm:$0xff] }
  0x10   :  { %2653 = vmatmul.mubr.msk.f32.gmra.mrb[4].mxu0 %vm57_vm0, %v35_v21  ;;  %2953 = vmatpush3.bf16.msra.mxu1 %v3528_v53  ;;  %v225_v21 = vld [vmem:[%s3887_s6] sm:$0xff] }
  0x11   :  { %164 = vmatprep.mubr.f32.mxu0 %v3353_v5  ;;  %2955 = vmatprep.subr.bf16.mxu1 %v3533_v55 }
  0x14   :  { %2654 = vmatmul.mubr.msk.f32.gmra.mrb[6].mxu0 %vm57_vm0, %v36_v22  ;;  %2957 = vmatpush3.bf16.msra.mxu1 %v3533_v55  ;;  %v226_v22 = vld [vmem:[%s3887_s6 + $0x8] sm:$0xff] }
  0x15   :  { %170 = vmatprep.mubr.f32.mxu0 %v3353_v5 }
  0x18   :  { %2655 = vmatmul.mubr.msk.f32.gmra.mrb[8].mxu0 %vm57_vm0, %v37_v23  ;;  %v3566_v23 = vpack.c.bf16 %v226_v22, %v225_v21 }
  0x19   :  { %176 = vmatprep.mubr.f32.mxu0 %v3353_v5 }
  0x1a   :  { %2959 = vmatprep.subr.bf16.mxu1 %v3566_v23 }
  0x1c   :  { %2656 = vmatmul.mubr.msk.f32.gmra.mrb[10].mxu0 %vm57_vm0, %v38_v24 }
  0x1d   :  { %182 = vmatprep.mubr.f32.mxu0 %v3353_v5 }
  0x20   :  { %2657 = vmatmul.mubr.msk.f32.gmra.mrb[12].mxu0 %vm57_vm0, %v39_v25 }
  0x21   :  { %188 = vmatprep.mubr.f32.mxu0 %v3353_v5 }
  0x24   :  { %2658 = vmatmul.mubr.msk.f32.gmra.mrb[14].mxu0 %vm57_vm0, %v40_v26 }
  0x25   :  { %302 = vmatprep.mubr.f32.mxu0 %v3353_v5 }
  0x28   :  { %303 = vmatmul.mubr.f32.vlgmr.msra.gmra.mrb[0].mxu0 %v3353_v5 }
  0x29   :  { %2965 = vmatpush1.bf16.msra.mxu0 %v3440_v13  ;;  %598 = vmatprep.mubr.f32.mxu0 %v3353_v5 }
  0x2a   :  { %2967 = vmatprep.subr.bf16.mxu0 %v3449_v16 }
  0x2d   :  { %2969 = vmatpush1.bf16.msra.mxu0 %v3463_v20 }
  0x2e   :  { %2983 = vmatprep.subr.bf16.mxu0 %v3435_v11 }
  0xfb   :  { %v304_v32 = vpop.f32.mrb[0].mxu0 }
  0xfc   :  { %v3102_v33 = vadd.f32 %v304_v32, %v3509_v31  ;;  %v306_v34 = vpop.f32.mrb[1].mxu0  ;;  %v3587_v32 = vld [vmem:[%s3888_s7] sm:$0xff] }
  0xfd   :  { %v3103_v38 = vadd.f32 %v306_v34, %v3512_v37 }
  0xfe   :  { %v2659_v35 = vmul.f32 -1.442695, %v3102_v33 }
  0xff   :  { %v2660_v44 = vmul.f32 -1.442695, %v3103_v38 }
 0x100   :  { %3141 = vpow2.f32 %v2659_v35 }
 0x101   :  { %3143 = vtanh.f32 %v3103_v38 }
 0x10a   :  { %v3142_v39 = vpop.eup %3141 }
 0x10b   :  { %v314_v40 = vadd.f32 1.0, %v3142_v39  ;;  %v3144_v41 = vpop.eup %3143 }
 0x10d   :  { %3145 = vrcp.f32 %v314_v40 }
 0x10e   :  { %3147 = vpow2.f32 %v2660_v44 }
 0x117   :  { %v3146_v42 = vpop.eup %3145 }
 0x118   :  { %v325_v43 = vmul.f32 %v3146_v42, %v3144_v41  ;;  %v3148_v45 = vpop.eup %3147  ;;  %v324_v47 = vmul.f32 0.0, %v3146_v42 }
 0x119   :  { %v321_v46 = vadd.f32 1.0, %v3148_v45 }
 0x11a   :  { %327 = vrot.lane.b32.xlu0 %v325_v43, %s3354_s3 }
 0x11b   :  { %3149 = vrcp.f32 %v321_v46 }
 0x125   :  { %v3150_v56 = vpop.eup %3149 }
 0x18c   :  { %v328_v48 = vpop.permute.xlu0 %327 }
 0x18d   :  { %v3516_v49 = vadd.f32 %v328_v48, %v324_v47 }
 0x18f   :  { %3151 = vtanh.f32 %v3516_v49 }
 0x199   :  { %v3152_v57 = vpop.eup %3151 }
 0x19a   :  { %v332_v58 = vmul.f32 %v3152_v57, %v3150_v56 }
 0x19c   :  { %336 = vrot.lane.b32.xlu1 %v332_v58, %s3354_s3  ;;  %334 = vrot.lane.b32.xlu0 %v332_v58, %s3355_s13 }
 0x20e   :  { %v337_v59 = vpop.permute.xlu1 %336  ;;  %v335_v60 = vpop.permute.xlu0 %334 }
 0x20f   :  { %2802 = vmatprep.mubr.msk.f32.mxu1 %vm234_vm1, %v337_v59  ;;  %338 = vrot.lane.b32.xlu1 %v335_v60, %s3354_s3 }
 0x281   :  { %v339_v61 = vpop.permute.xlu1 %338 }
 0x282   :  { %2803 = vmatmul.mubr.msk.f32.vlgmr.msra.gmra.mrb[0].mxu1 %vm234_vm1, %v339_v61 }
 0x283   :  { %2961 = vmatpush3.bf16.msra.mxu1 %v3566_v23 }
 0x284   :  { %2971 = vmatprep.subr.bf16.mxu1 %v3528_v53 }
 0x355   :  { %v2804_v0 = vpop.f32.mrb[0].mxu1 }
 0x356   :  { %v416_v1 = vadd.f32 %v2804_v0, %v3547_v62  ;;  %v410_v2 = vpop.f32.mrb[1].mxu1 }
 0x357   :  { %v411_v3 = vadd.f32 %v410_v2, %v3552_v63 }
 0x358   :  { %v422_v4 = vsel %vm57_vm0, %v416_v1, -inf }
 0x359   :  { %423 = vmax.xlane.f32.xlu1 %v422_v4  ;;  %v419_v6 = vsel %vm57_vm0, %v411_v3, -inf }
 0x35a   :  { %420 = vmax.xlane.f32.xlu0 %v419_v6 }
 0x3e6   :  { %v424_v7 = vpop.xlane.xlu1 %423 }
 0x3e7   :  { %v426_v8 = vsub.f32 %v416_v1, %v424_v7  ;;  %v421_v9 = vpop.xlane.xlu0 %420 }
 0x3e8   :  { %v425_v10 = vsub.f32 %v411_v3, %v421_v9 }
 0x3e9   :  { %v429_v12 = vmul.f32 1.442695, %v426_v8 }
 0x3ea   :  { %v427_v14 = vmul.f32 1.442695, %v425_v10 }
 0x3ec   :  { %3153 = vpow2.f32 %v427_v14 }
 0x3ed   :  { %3155 = vpow2.f32 %v429_v12 }
 0x3f6   :  { %v3154_v15 = vpop.eup %3153 }
 0x3f7   :  { %v431_v17 = vsel %vm57_vm0, %v3154_v15, 0.0  ;;  %v3156_v18 = vpop.eup %3155 }
 0x3f8   :  { %432 = vadd.xlane.f32.xlu0 %v431_v17  ;;  %v434_v19 = vsel %vm57_vm0, %v3156_v18, 0.0 }
 0x3fc   :  { %435 = vadd.xlane.f32.xlu0 %v434_v19 }
 0x485   :  { %v433_v24 = vpop.xlane.xlu0 %432 }
 0x486   :  { %3157 = vrcp.f32 %v433_v24 }
 0x489   :  { %v436_v25 = vpop.xlane.xlu0 %435 }
 0x48a   :  { %3159 = vrcp.f32 %v436_v25 }
 0x490   :  { %v3158_v26 = vpop.eup %3157 }
 0x491   :  { %v439_v27 = vmul.f32 %v3158_v26, %v3154_v15 }
 0x493   :  { %2809 = vmatprep.mubr.msk.f32.mxu1 %vm57_vm0, %v439_v27  ;;  %524 = vst.msk [vmem:[#allocation5] sm:$0xff] %vm57_vm0, %v439_v27 }
 0x494   :  { %v3160_v28 = vpop.eup %3159 }
 0x495   :  { %v440_v29 = vmul.f32 %v3160_v28, %v3156_v18 }
 0x497   :  { %525 = vst.msk [vmem:[#allocation5 + $0x8] sm:$0xff] %vm57_vm0, %v440_v29  ;;  %2810 = vmatmul.mubr.msk.f32.vlgmr.msra.gmra.mrb[2].mxu1 %vm57_vm0, %v440_v29 }
 0x498   :  { %2973 = vmatpush3.bf16.msra.mxu1 %v3528_v53 }
 0x499   :  { %2975 = vmatprep.subr.bf16.mxu1 %v3533_v55 }
 0x49c   :  { %2977 = vmatpush3.bf16.msra.mxu1 %v3533_v55 }
 0x49d   :  { %2979 = vmatprep.subr.bf16.mxu1 %v3566_v23 }
 0x56a   :  { %v2811_v33 = vpop.f32.mrb[2].mxu1 }
 0x56b   :  { %v519_v34 = vadd.f32 %v2811_v33, %v3582_v30  ;;  %v513_v35 = vpop.f32.mrb[3].mxu1 }
 0x56c   :  { %v514_v36 = vadd.f32 %v513_v35, %v3587_v32 }
 0x56e   :  { %v522_v38 = vmul.f32 %v519_v34, %v514_v36 }
 0x570   :  { %523 = vst.msk [vmem:[#allocation3] sm:$0xff] %vm234_vm1, %v522_v38  ;;  %2665 = vmatmul.mubr.msk.f32.vlgmr.msra.gmra.mrb[2].mxu0 %vm234_vm1, %v522_v38 }
 0x571   :  { %2985 = vmatpush1.bf16.msra.mxu0 %v3440_v13  ;;  %896 = vmatprep.mubr.f32.mxu0 %v3353_v5 }
 0x572   :  { %2987 = vmatprep.subr.bf16.mxu0 %v3449_v16 }
 0x575   :  { %2989 = vmatpush1.bf16.msra.mxu0 %v3463_v20 }
 0x576   :  { %3003 = vmatprep.subr.bf16.mxu0 %v3435_v11 }
 0x643   :  { %v600_v39 = vpop.f32.mrb[2].mxu0 }
 0x644   :  { %v3104_v40 = vadd.f32 %v600_v39, %v3509_v31  ;;  %v602_v41 = vpop.f32.mrb[3].mxu0 }
 0x645   :  { %v3105_v43 = vadd.f32 %v602_v41, %v3512_v37 }
 0x646   :  { %v2666_v42 = vmul.f32 -1.442695, %v3104_v40 }
 0x647   :  { %v2667_v50 = vmul.f32 -1.442695, %v3105_v43 }
 0x648   :  { %3161 = vpow2.f32 %v2666_v42 }
 0x649   :  { %3163 = vtanh.f32 %v3105_v43 }
 0x652   :  { %v3162_v44 = vpop.eup %3161 }
 0x653   :  { %v610_v45 = vadd.f32 1.0, %v3162_v44  ;;  %v3164_v46 = vpop.eup %3163 }
 0x655   :  { %3165 = vrcp.f32 %v610_v45 }
 0x656   :  { %3167 = vpow2.f32 %v2667_v50 }
 0x65f   :  { %v3166_v47 = vpop.eup %3165 }
 0x660   :  { %v621_v48 = vmul.f32 %v3166_v47, %v3164_v46  ;;  %v3168_v51 = vpop.eup %3167  ;;  %v620_v54 = vmul.f32 %v3166_v47, %v3516_v49 }
 0x661   :  { %v617_v52 = vadd.f32 1.0, %v3168_v51 }
 0x662   :  { %623 = vrot.lane.b32.xlu1 %v621_v48, %s3354_s3 }
 0x663   :  { %3169 = vrcp.f32 %v617_v52 }
 0x66d   :  { %v3170_v58 = vpop.eup %3169 }
 0x6d4   :  { %v624_v56 = vpop.permute.xlu1 %623 }
 0x6d5   :  { %v3602_v57 = vadd.f32 %v624_v56, %v620_v54 }
 0x6d7   :  { %3171 = vtanh.f32 %v3602_v57 }
 0x6e1   :  { %v3172_v59 = vpop.eup %3171 }
 0x6e2   :  { %v628_v60 = vmul.f32 %v3172_v59, %v3170_v58 }
 0x6e4   :  { %632 = vrot.lane.b32.xlu1 %v628_v60, %s3354_s3  ;;  %630 = vrot.lane.b32.xlu0 %v628_v60, %s3355_s13 }
 0x756   :  { %v633_v61 = vpop.permute.xlu1 %632  ;;  %v631_v0 = vpop.permute.xlu0 %630 }
 0x757   :  { %2820 = vmatprep.mubr.msk.f32.mxu1 %vm234_vm1, %v633_v61  ;;  %634 = vrot.lane.b32.xlu1 %v631_v0, %s3354_s3 }
 0x7c9   :  { %v635_v49 = vpop.permute.xlu1 %634 }
 0x7ca   :  { %2821 = vmatmul.mubr.msk.f32.vlgmr.msra.gmra.mrb[4].mxu1 %vm234_vm1, %v635_v49 }
 0x7cb   :  { %2981 = vmatpush3.bf16.msra.mxu1 %v3566_v23 }
 0x7cc   :  { %2991 = vmatprep.subr.bf16.mxu1 %v3528_v53 }
 0x89d   :  { %v2822_v1 = vpop.f32.mrb[4].mxu1 }
 0x89e   :  { %v712_v2 = vadd.f32 %v2822_v1, %v3547_v62  ;;  %v706_v3 = vpop.f32.mrb[5].mxu1 }
 0x89f   :  { %v707_v4 = vadd.f32 %v706_v3, %v3552_v63 }
 0x8a0   :  { %v718_v6 = vsel %vm57_vm0, %v712_v2, -inf }
 0x8a1   :  { %719 = vmax.xlane.f32.xlu1 %v718_v6  ;;  %v715_v7 = vsel %vm57_vm0, %v707_v4, -inf }
 0x8a2   :  { %716 = vmax.xlane.f32.xlu0 %v715_v7 }
 0x92e   :  { %v720_v8 = vpop.xlane.xlu1 %719 }
 0x92f   :  { %v722_v9 = vsub.f32 %v712_v2, %v720_v8  ;;  %v717_v10 = vpop.xlane.xlu0 %716 }
 0x930   :  { %v721_v12 = vsub.f32 %v707_v4, %v717_v10 }
 0x931   :  { %v725_v14 = vmul.f32 1.442695, %v722_v9 }
 0x932   :  { %v723_v15 = vmul.f32 1.442695, %v721_v12 }
 0x934   :  { %3173 = vpow2.f32 %v723_v15 }
 0x935   :  { %3175 = vpow2.f32 %v725_v14 }
 0x93e   :  { %v3174_v17 = vpop.eup %3173 }
 0x93f   :  { %v727_v18 = vsel %vm57_vm0, %v3174_v17, 0.0  ;;  %v3176_v19 = vpop.eup %3175 }
 0x940   :  { %728 = vadd.xlane.f32.xlu0 %v727_v18  ;;  %v730_v21 = vsel %vm57_vm0, %v3176_v19, 0.0 }
 0x944   :  { %731 = vadd.xlane.f32.xlu0 %v730_v21 }
 0x9cd   :  { %v729_v22 = vpop.xlane.xlu0 %728 }
 0x9ce   :  { %3177 = vrcp.f32 %v729_v22 }
 0x9d1   :  { %v732_v24 = vpop.xlane.xlu0 %731 }
 0x9d2   :  { %3179 = vrcp.f32 %v732_v24 }
 0x9d8   :  { %v3178_v25 = vpop.eup %3177 }
 0x9d9   :  { %v735_v26 = vmul.f32 %v3178_v25, %v3174_v17 }
 0x9db   :  { %2827 = vmatprep.mubr.msk.f32.mxu1 %vm57_vm0, %v735_v26  ;;  %822 = vst.msk [vmem:[#allocation5 + $0x10] sm:$0xff] %vm57_vm0, %v735_v26 }
 0x9dc   :  { %v3180_v27 = vpop.eup %3179 }
 0x9dd   :  { %v736_v28 = vmul.f32 %v3180_v27, %v3176_v19 }
 0x9df   :  { %823 = vst.msk [vmem:[#allocation5 + $0x18] sm:$0xff] %vm57_vm0, %v736_v28  ;;  %2828 = vmatmul.mubr.msk.f32.vlgmr.msra.gmra.mrb[6].mxu1 %vm57_vm0, %v736_v28 }
 0x9e0   :  { %2993 = vmatpush3.bf16.msra.mxu1 %v3528_v53 }
 0x9e1   :  { %2995 = vmatprep.subr.bf16.mxu1 %v3533_v55 }
 0x9e4   :  { %2997 = vmatpush3.bf16.msra.mxu1 %v3533_v55 }
 0x9e5   :  { %2999 = vmatprep.subr.bf16.mxu1 %v3566_v23 }
 0xab2   :  { %v2829_v29 = vpop.f32.mrb[6].mxu1 }
 0xab3   :  { %v815_v33 = vadd.f32 %v2829_v29, %v3582_v30  ;;  %v809_v34 = vpop.f32.mrb[7].mxu1 }
 0xab4   :  { %v810_v35 = vadd.f32 %v809_v34, %v3587_v32 }
 0xab6   :  { %v818_v36 = vmul.f32 %v815_v33, %v810_v35 }
 0xab8   :  { %820 = vst.msk [vmem:[#allocation3 + $0x8] sm:$0xff] %vm234_vm1, %v818_v36  ;;  %2672 = vmatmul.mubr.msk.f32.vlgmr.msra.gmra.mrb[4].mxu0 %vm234_vm1, %v818_v36 }
 0xab9   :  { %3005 = vmatpush1.bf16.msra.mxu0 %v3440_v13  ;;  %1194 = vmatprep.mubr.f32.mxu0 %v3353_v5 }
 0xaba   :  { %3007 = vmatprep.subr.bf16.mxu0 %v3449_v16 }
 0xabd   :  { %3009 = vmatpush1.bf16.msra.mxu0 %v3463_v20 }
 0xabe   :  { %3023 = vmatprep.subr.bf16.mxu0 %v3435_v11 }
 0xb8b   :  { %v898_v38 = vpop.f32.mrb[4].mxu0 }
 0xb8c   :  { %v3106_v39 = vadd.f32 %v898_v38, %v3509_v31  ;;  %v900_v40 = vpop.f32.mrb[5].mxu0 }
 0xb8d   :  { %v3107_v42 = vadd.f32 %v900_v40, %v3512_v37 }
 0xb8e   :  { %v2673_v41 = vmul.f32 -1.442695, %v3106_v39 }
 0xb8f   :  { %v2674_v48 = vmul.f32 -1.442695, %v3107_v42 }
 0xb90   :  { %3181 = vpow2.f32 %v2673_v41 }
 0xb91   :  { %3183 = vtanh.f32 %v3107_v42 }
 0xb9a   :  { %v3182_v43 = vpop.eup %3181 }
 0xb9b   :  { %v908_v44 = vadd.f32 1.0, %v3182_v43  ;;  %v3184_v45 = vpop.eup %3183 }
 0xb9d   :  { %3185 = vrcp.f32 %v908_v44 }
 0xb9e   :  { %3187 = vpow2.f32 %v2674_v48 }
 0xba7   :  { %v3186_v46 = vpop.eup %3185 }
 0xba8   :  { %v919_v47 = vmul.f32 %v3186_v46, %v3184_v45  ;;  %v3188_v50 = vpop.eup %3187  ;;  %v918_v52 = vmul.f32 %v3186_v46, %v3602_v57 }
 0xba9   :  { %v915_v51 = vadd.f32 1.0, %v3188_v50 }
 0xbaa   :  { %921 = vrot.lane.b32.xlu1 %v919_v47, %s3354_s3 }
 0xbab   :  { %3189 = vrcp.f32 %v915_v51 }
 0xbb5   :  { %v3190_v58 = vpop.eup %3189 }
 0xc1c   :  { %v922_v54 = vpop.permute.xlu1 %921 }
 0xc1d   :  { %v3639_v56 = vadd.f32 %v922_v54, %v918_v52 }
 0xc1f   :  { %3191 = vtanh.f32 %v3639_v56 }
 0xc29   :  { %v3192_v59 = vpop.eup %3191 }
 0xc2a   :  { %v926_v60 = vmul.f32 %v3192_v59, %v3190_v58 }
 0xc2c   :  { %930 = vrot.lane.b32.xlu1 %v926_v60, %s3354_s3  ;;  %928 = vrot.lane.b32.xlu0 %v926_v60, %s3355_s13 }
 0xc9e   :  { %v931_v61 = vpop.permute.xlu1 %930  ;;  %v929_v0 = vpop.permute.xlu0 %928 }
 0xc9f   :  { %2838 = vmatprep.mubr.msk.f32.mxu1 %vm234_vm1, %v931_v61  ;;  %932 = vrot.lane.b32.xlu1 %v929_v0, %s3354_s3 }
 0xd11   :  { %v933_v57 = vpop.permute.xlu1 %932 }
 0xd12   :  { %2839 = vmatmul.mubr.msk.f32.vlgmr.msra.gmra.mrb[8].mxu1 %vm234_vm1, %v933_v57 }
 0xd13   :  { %3001 = vmatpush3.bf16.msra.mxu1 %v3566_v23 }
 0xd14   :  { %3011 = vmatprep.subr.bf16.mxu1 %v3528_v53 }
 0xde5   :  { %v2840_v49 = vpop.f32.mrb[8].mxu1 }
 0xde6   :  { %v1010_v1 = vadd.f32 %v2840_v49, %v3547_v62  ;;  %v1004_v2 = vpop.f32.mrb[9].mxu1 }
 0xde7   :  { %v1005_v3 = vadd.f32 %v1004_v2, %v3552_v63 }
 0xde8   :  { %v1016_v4 = vsel %vm57_vm0, %v1010_v1, -inf }
 0xde9   :  { %1017 = vmax.xlane.f32.xlu1 %v1016_v4  ;;  %v1013_v6 = vsel %vm57_vm0, %v1005_v3, -inf }
 0xdea   :  { %1014 = vmax.xlane.f32.xlu0 %v1013_v6 }
 0xe76   :  { %v1018_v7 = vpop.xlane.xlu1 %1017 }
 0xe77   :  { %v1020_v8 = vsub.f32 %v1010_v1, %v1018_v7  ;;  %v1015_v9 = vpop.xlane.xlu0 %1014 }
 0xe78   :  { %v1019_v10 = vsub.f32 %v1005_v3, %v1015_v9 }
 0xe79   :  { %v1023_v12 = vmul.f32 1.442695, %v1020_v8 }
 0xe7a   :  { %v1021_v14 = vmul.f32 1.442695, %v1019_v10 }
 0xe7c   :  { %3193 = vpow2.f32 %v1021_v14 }
 0xe7d   :  { %3195 = vpow2.f32 %v1023_v12 }
 0xe86   :  { %v3194_v15 = vpop.eup %3193 }
 0xe87   :  { %v1025_v17 = vsel %vm57_vm0, %v3194_v15, 0.0  ;;  %v3196_v18 = vpop.eup %3195 }
 0xe88   :  { %1026 = vadd.xlane.f32.xlu0 %v1025_v17  ;;  %v1028_v19 = vsel %vm57_vm0, %v3196_v18, 0.0 }
 0xe8c   :  { %1029 = vadd.xlane.f32.xlu0 %v1028_v19 }
 0xf15   :  { %v1027_v21 = vpop.xlane.xlu0 %1026 }
 0xf16   :  { %3197 = vrcp.f32 %v1027_v21 }
 0xf19   :  { %v1030_v22 = vpop.xlane.xlu0 %1029 }
 0xf1a   :  { %3199 = vrcp.f32 %v1030_v22 }
 0xf20   :  { %v3198_v24 = vpop.eup %3197 }
 0xf21   :  { %v1033_v25 = vmul.f32 %v3198_v24, %v3194_v15 }
 0xf23   :  { %2845 = vmatprep.mubr.msk.f32.mxu1 %vm57_vm0, %v1033_v25  ;;  %1120 = vst.msk [vmem:[#allocation5 + $0x20] sm:$0xff] %vm57_vm0, %v1033_v25 }
 0xf24   :  { %v3200_v26 = vpop.eup %3199 }
 0xf25   :  { %v1034_v27 = vmul.f32 %v3200_v26, %v3196_v18 }
 0xf27   :  { %1121 = vst.msk [vmem:[#allocation5 + $0x28] sm:$0xff] %vm57_vm0, %v1034_v27  ;;  %2846 = vmatmul.mubr.msk.f32.vlgmr.msra.gmra.mrb[10].mxu1 %vm57_vm0, %v1034_v27 }
 0xf28   :  { %3013 = vmatpush3.bf16.msra.mxu1 %v3528_v53 }
 0xf29   :  { %3015 = vmatprep.subr.bf16.mxu1 %v3533_v55 }
 0xf2c   :  { %3017 = vmatpush3.bf16.msra.mxu1 %v3533_v55 }
 0xf2d   :  { %3019 = vmatprep.subr.bf16.mxu1 %v3566_v23 }
 0xffa   :  { %v2847_v28 = vpop.f32.mrb[10].mxu1 }
 0xffb   :  { %v1113_v29 = vadd.f32 %v2847_v28, %v3582_v30  ;;  %v1107_v33 = vpop.f32.mrb[11].mxu1 }
 0xffc   :  { %v1108_v34 = vadd.f32 %v1107_v33, %v3587_v32 }
 0xffe   :  { %v1116_v35 = vmul.f32 %v1113_v29, %v1108_v34 }
0x1000   :  { %1118 = vst.msk [vmem:[#allocation3 + $0x10] sm:$0xff] %vm234_vm1, %v1116_v35  ;;  %2679 = vmatmul.mubr.msk.f32.vlgmr.msra.gmra.mrb[6].mxu0 %vm234_vm1, %v1116_v35 }
0x1001   :  { %3025 = vmatpush1.bf16.msra.mxu0 %v3440_v13  ;;  %1492 = vmatprep.mubr.f32.mxu0 %v3353_v5 }
0x1002   :  { %3027 = vmatprep.subr.bf16.mxu0 %v3449_v16 }
0x1005   :  { %3029 = vmatpush1.bf16.msra.mxu0 %v3463_v20 }
0x1006   :  { %3043 = vmatprep.subr.bf16.mxu0 %v3435_v11 }
0x10d3   :  { %v1196_v36 = vpop.f32.mrb[6].mxu0 }
0x10d4   :  { %v3108_v38 = vadd.f32 %v1196_v36, %v3509_v31  ;;  %v1198_v39 = vpop.f32.mrb[7].mxu0 }
0x10d5   :  { %v3109_v41 = vadd.f32 %v1198_v39, %v3512_v37 }
0x10d6   :  { %v2680_v40 = vmul.f32 -1.442695, %v3108_v38 }
0x10d7   :  { %v2681_v47 = vmul.f32 -1.442695, %v3109_v41 }
0x10d8   :  { %3201 = vpow2.f32 %v2680_v40 }
0x10d9   :  { %3203 = vtanh.f32 %v3109_v41 }
0x10e2   :  { %v3202_v42 = vpop.eup %3201 }
0x10e3   :  { %v1206_v43 = vadd.f32 1.0, %v3202_v42  ;;  %v3204_v44 = vpop.eup %3203 }
0x10e5   :  { %3205 = vrcp.f32 %v1206_v43 }
0x10e6   :  { %3207 = vpow2.f32 %v2681_v47 }
0x10ef   :  { %v3206_v45 = vpop.eup %3205 }
0x10f0   :  { %v1217_v46 = vmul.f32 %v3206_v45, %v3204_v44  ;;  %v3208_v48 = vpop.eup %3207  ;;  %v1216_v51 = vmul.f32 %v3206_v45, %v3639_v56 }
0x10f1   :  { %v1213_v50 = vadd.f32 1.0, %v3208_v48 }
0x10f2   :  { %1219 = vrot.lane.b32.xlu1 %v1217_v46, %s3354_s3 }
0x10f3   :  { %3209 = vrcp.f32 %v1213_v50 }
0x10fd   :  { %v3210_v58 = vpop.eup %3209 }
0x1164   :  { %v1220_v52 = vpop.permute.xlu1 %1219 }
0x1165   :  { %v3676_v54 = vadd.f32 %v1220_v52, %v1216_v51 }
0x1167   :  { %3211 = vtanh.f32 %v3676_v54 }
0x1171   :  { %v3212_v59 = vpop.eup %3211 }
0x1172   :  { %v1224_v60 = vmul.f32 %v3212_v59, %v3210_v58 }
0x1174   :  { %1228 = vrot.lane.b32.xlu1 %v1224_v60, %s3354_s3  ;;  %1226 = vrot.lane.b32.xlu0 %v1224_v60, %s3355_s13 }
0x11e6   :  { %v1229_v61 = vpop.permute.xlu1 %1228  ;;  %v1227_v0 = vpop.permute.xlu0 %1226 }
0x11e7   :  { %2856 = vmatprep.mubr.msk.f32.mxu1 %vm234_vm1, %v1229_v61  ;;  %1230 = vrot.lane.b32.xlu1 %v1227_v0, %s3354_s3 }
0x1259   :  { %v1231_v56 = vpop.permute.xlu1 %1230 }
0x125a   :  { %2857 = vmatmul.mubr.msk.f32.vlgmr.msra.gmra.mrb[12].mxu1 %vm234_vm1, %v1231_v56 }
0x125b   :  { %3021 = vmatpush3.bf16.msra.mxu1 %v3566_v23 }
0x125c   :  { %3031 = vmatprep.subr.bf16.mxu1 %v3528_v53 }
0x132d   :  { %v2858_v57 = vpop.f32.mrb[12].mxu1 }
0x132e   :  { %v1308_v49 = vadd.f32 %v2858_v57, %v3547_v62  ;;  %v1302_v1 = vpop.f32.mrb[13].mxu1 }
0x132f   :  { %v1303_v2 = vadd.f32 %v1302_v1, %v3552_v63 }
0x1330   :  { %v1314_v3 = vsel %vm57_vm0, %v1308_v49, -inf }
0x1331   :  { %1315 = vmax.xlane.f32.xlu1 %v1314_v3  ;;  %v1311_v4 = vsel %vm57_vm0, %v1303_v2, -inf }
0x1332   :  { %1312 = vmax.xlane.f32.xlu0 %v1311_v4 }
0x13be   :  { %v1316_v6 = vpop.xlane.xlu1 %1315 }
0x13bf   :  { %v1318_v7 = vsub.f32 %v1308_v49, %v1316_v6  ;;  %v1313_v8 = vpop.xlane.xlu0 %1312 }
0x13c0   :  { %v1317_v9 = vsub.f32 %v1303_v2, %v1313_v8 }
0x13c1   :  { %v1321_v10 = vmul.f32 1.442695, %v1318_v7 }
0x13c2   :  { %v1319_v12 = vmul.f32 1.442695, %v1317_v9 }
0x13c4   :  { %3213 = vpow2.f32 %v1319_v12 }
0x13c5   :  { %3215 = vpow2.f32 %v1321_v10 }
0x13ce   :  { %v3214_v14 = vpop.eup %3213 }
0x13cf   :  { %v1323_v15 = vsel %vm57_vm0, %v3214_v14, 0.0  ;;  %v3216_v17 = vpop.eup %3215 }
0x13d0   :  { %1324 = vadd.xlane.f32.xlu0 %v1323_v15  ;;  %v1326_v18 = vsel %vm57_vm0, %v3216_v17, 0.0 }
0x13d4   :  { %1327 = vadd.xlane.f32.xlu0 %v1326_v18 }
0x145d   :  { %v1325_v19 = vpop.xlane.xlu0 %1324 }
0x145e   :  { %3217 = vrcp.f32 %v1325_v19 }
0x1461   :  { %v1328_v21 = vpop.xlane.xlu0 %1327 }
0x1462   :  { %3219 = vrcp.f32 %v1328_v21 }
0x1468   :  { %v3218_v22 = vpop.eup %3217 }
0x1469   :  { %v1331_v24 = vmul.f32 %v3218_v22, %v3214_v14 }
0x146b   :  { %2863 = vmatprep.mubr.msk.f32.mxu1 %vm57_vm0, %v1331_v24  ;;  %1418 = vst.msk [vmem:[#allocation5 + $0x30] sm:$0xff] %vm57_vm0, %v1331_v24 }
0x146c   :  { %v3220_v25 = vpop.eup %3219 }
0x146d   :  { %v1332_v26 = vmul.f32 %v3220_v25, %v3216_v17 }
0x146f   :  { %1419 = vst.msk [vmem:[#allocation5 + $0x38] sm:$0xff] %vm57_vm0, %v1332_v26  ;;  %2864 = vmatmul.mubr.msk.f32.vlgmr.msra.gmra.mrb[14].mxu1 %vm57_vm0, %v1332_v26 }
0x1470   :  { %3033 = vmatpush3.bf16.msra.mxu1 %v3528_v53 }
0x1471   :  { %3035 = vmatprep.subr.bf16.mxu1 %v3533_v55 }
0x1474   :  { %3037 = vmatpush3.bf16.msra.mxu1 %v3533_v55 }
0x1475   :  { %3039 = vmatprep.subr.bf16.mxu1 %v3566_v23 }
0x1542   :  { %v2865_v27 = vpop.f32.mrb[14].mxu1 }
0x1543   :  { %v1411_v28 = vadd.f32 %v2865_v27, %v3582_v30  ;;  %v1405_v29 = vpop.f32.mrb[15].mxu1 }
0x1544   :  { %v1406_v33 = vadd.f32 %v1405_v29, %v3587_v32 }
0x1546   :  { %v1414_v34 = vmul.f32 %v1411_v28, %v1406_v33 }
0x1548   :  { %1416 = vst.msk [vmem:[#allocation3 + $0x18] sm:$0xff] %vm234_vm1, %v1414_v34  ;;  %2686 = vmatmul.mubr.msk.f32.vlgmr.msra.gmra.mrb[8].mxu0 %vm234_vm1, %v1414_v34 }
0x1549   :  { %3045 = vmatpush1.bf16.msra.mxu0 %v3440_v13  ;;  %1790 = vmatprep.mubr.f32.mxu0 %v3353_v5 }
0x154a   :  { %3047 = vmatprep.subr.bf16.mxu0 %v3449_v16 }
0x154d   :  { %3049 = vmatpush1.bf16.msra.mxu0 %v3463_v20 }
0x154e   :  { %3063 = vmatprep.subr.bf16.mxu0 %v3435_v11 }
0x161b   :  { %v1494_v35 = vpop.f32.mrb[8].mxu0 }
0x161c   :  { %v3110_v36 = vadd.f32 %v1494_v35, %v3509_v31  ;;  %v1496_v38 = vpop.f32.mrb[9].mxu0 }
0x161d   :  { %v3111_v40 = vadd.f32 %v1496_v38, %v3512_v37 }
0x161e   :  { %v2687_v39 = vmul.f32 -1.442695, %v3110_v36 }
0x161f   :  { %v2688_v46 = vmul.f32 -1.442695, %v3111_v40 }
0x1620   :  { %3221 = vpow2.f32 %v2687_v39 }
0x1621   :  { %3223 = vtanh.f32 %v3111_v40 }
0x162a   :  { %v3222_v41 = vpop.eup %3221 }
0x162b   :  { %v1504_v42 = vadd.f32 1.0, %v3222_v41  ;;  %v3224_v43 = vpop.eup %3223 }
0x162d   :  { %3225 = vrcp.f32 %v1504_v42 }
0x162e   :  { %3227 = vpow2.f32 %v2688_v46 }
0x1637   :  { %v3226_v44 = vpop.eup %3225 }
0x1638   :  { %v1515_v45 = vmul.f32 %v3226_v44, %v3224_v43  ;;  %v3228_v47 = vpop.eup %3227  ;;  %v1514_v50 = vmul.f32 %v3226_v44, %v3676_v54 }
0x1639   :  { %v1511_v48 = vadd.f32 1.0, %v3228_v47 }
0x163a   :  { %1517 = vrot.lane.b32.xlu1 %v1515_v45, %s3354_s3 }
0x163b   :  { %3229 = vrcp.f32 %v1511_v48 }
0x1645   :  { %v3230_v58 = vpop.eup %3229 }
0x16ac   :  { %v1518_v51 = vpop.permute.xlu1 %1517 }
0x16ad   :  { %v3713_v52 = vadd.f32 %v1518_v51, %v1514_v50 }
0x16af   :  { %3231 = vtanh.f32 %v3713_v52 }
0x16b9   :  { %v3232_v59 = vpop.eup %3231 }
0x16ba   :  { %v1522_v60 = vmul.f32 %v3232_v59, %v3230_v58 }
0x16bc   :  { %1526 = vrot.lane.b32.xlu1 %v1522_v60, %s3354_s3  ;;  %1524 = vrot.lane.b32.xlu0 %v1522_v60, %s3355_s13 }
0x172e   :  { %v1527_v61 = vpop.permute.xlu1 %1526  ;;  %v1525_v0 = vpop.permute.xlu0 %1524 }
0x172f   :  { %2874 = vmatprep.mubr.msk.f32.mxu1 %vm234_vm1, %v1527_v61  ;;  %1528 = vrot.lane.b32.xlu1 %v1525_v0, %s3354_s3 }
0x17a1   :  { %v1529_v54 = vpop.permute.xlu1 %1528 }
0x17a2   :  { %2875 = vmatmul.mubr.msk.f32.vlgmr.msra.gmra.mrb[16].mxu1 %vm234_vm1, %v1529_v54 }
0x17a3   :  { %3041 = vmatpush3.bf16.msra.mxu1 %v3566_v23 }
0x17a4   :  { %3051 = vmatprep.subr.bf16.mxu1 %v3528_v53 }
0x1875   :  { %v2876_v56 = vpop.f32.mrb[16].mxu1 }
0x1876   :  { %v1606_v57 = vadd.f32 %v2876_v56, %v3547_v62  ;;  %v1600_v49 = vpop.f32.mrb[17].mxu1 }
0x1877   :  { %v1601_v1 = vadd.f32 %v1600_v49, %v3552_v63 }
0x1878   :  { %v1612_v2 = vsel %vm57_vm0, %v1606_v57, -inf }
0x1879   :  { %1613 = vmax.xlane.f32.xlu1 %v1612_v2  ;;  %v1609_v3 = vsel %vm57_vm0, %v1601_v1, -inf }
0x187a   :  { %1610 = vmax.xlane.f32.xlu0 %v1609_v3 }
0x1906   :  { %v1614_v4 = vpop.xlane.xlu1 %1613 }
0x1907   :  { %v1616_v6 = vsub.f32 %v1606_v57, %v1614_v4  ;;  %v1611_v7 = vpop.xlane.xlu0 %1610 }
0x1908   :  { %v1615_v8 = vsub.f32 %v1601_v1, %v1611_v7 }
0x1909   :  { %v1619_v9 = vmul.f32 1.442695, %v1616_v6 }
0x190a   :  { %v1617_v10 = vmul.f32 1.442695, %v1615_v8 }
0x190c   :  { %3233 = vpow2.f32 %v1617_v10 }
0x190d   :  { %3235 = vpow2.f32 %v1619_v9 }
0x1916   :  { %v3234_v12 = vpop.eup %3233 }
0x1917   :  { %v1621_v14 = vsel %vm57_vm0, %v3234_v12, 0.0  ;;  %v3236_v15 = vpop.eup %3235 }
0x1918   :  { %1622 = vadd.xlane.f32.xlu0 %v1621_v14  ;;  %v1624_v17 = vsel %vm57_vm0, %v3236_v15, 0.0 }
0x191c   :  { %1625 = vadd.xlane.f32.xlu0 %v1624_v17 }
0x19a5   :  { %v1623_v18 = vpop.xlane.xlu0 %1622 }
0x19a6   :  { %3237 = vrcp.f32 %v1623_v18 }
0x19a9   :  { %v1626_v19 = vpop.xlane.xlu0 %1625 }
0x19aa   :  { %3239 = vrcp.f32 %v1626_v19 }
0x19b0   :  { %v3238_v21 = vpop.eup %3237 }
0x19b1   :  { %v1629_v22 = vmul.f32 %v3238_v21, %v3234_v12 }
0x19b3   :  { %2881 = vmatprep.mubr.msk.f32.mxu1 %vm57_vm0, %v1629_v22  ;;  %1716 = vst.msk [vmem:[#allocation5 + $0x40] sm:$0xff] %vm57_vm0, %v1629_v22 }
0x19b4   :  { %v3240_v24 = vpop.eup %3239 }
0x19b5   :  { %v1630_v25 = vmul.f32 %v3240_v24, %v3236_v15 }
0x19b7   :  { %1717 = vst.msk [vmem:[#allocation5 + $0x48] sm:$0xff] %vm57_vm0, %v1630_v25  ;;  %2882 = vmatmul.mubr.msk.f32.vlgmr.msra.gmra.mrb[18].mxu1 %vm57_vm0, %v1630_v25 }
0x19b8   :  { %3053 = vmatpush3.bf16.msra.mxu1 %v3528_v53 }
0x19b9   :  { %3055 = vmatprep.subr.bf16.mxu1 %v3533_v55 }
0x19bc   :  { %3057 = vmatpush3.bf16.msra.mxu1 %v3533_v55 }
0x19bd   :  { %3059 = vmatprep.subr.bf16.mxu1 %v3566_v23 }
0x1a8a   :  { %v2883_v26 = vpop.f32.mrb[18].mxu1 }
0x1a8b   :  { %v1709_v27 = vadd.f32 %v2883_v26, %v3582_v30  ;;  %v1703_v28 = vpop.f32.mrb[19].mxu1 }
0x1a8c   :  { %v1704_v29 = vadd.f32 %v1703_v28, %v3587_v32 }
0x1a8e   :  { %v1712_v33 = vmul.f32 %v1709_v27, %v1704_v29 }
0x1a90   :  { %1714 = vst.msk [vmem:[#allocation3 + $0x20] sm:$0xff] %vm234_vm1, %v1712_v33  ;;  %2693 = vmatmul.mubr.msk.f32.vlgmr.msra.gmra.mrb[10].mxu0 %vm234_vm1, %v1712_v33 }
0x1a91   :  { %3065 = vmatpush1.bf16.msra.mxu0 %v3440_v13  ;;  %2088 = vmatprep.mubr.f32.mxu0 %v3353_v5 }
0x1a92   :  { %3067 = vmatprep.subr.bf16.mxu0 %v3449_v16 }
0x1a95   :  { %3069 = vmatpush1.bf16.msra.mxu0 %v3463_v20 }
0x1a96   :  { %3083 = vmatprep.subr.bf16.mxu0 %v3435_v11 }
0x1b63   :  { %v1792_v34 = vpop.f32.mrb[10].mxu0 }
0x1b64   :  { %v3112_v35 = vadd.f32 %v1792_v34, %v3509_v31  ;;  %v1794_v36 = vpop.f32.mrb[11].mxu0 }
0x1b65   :  { %v3113_v39 = vadd.f32 %v1794_v36, %v3512_v37 }
0x1b66   :  { %v2694_v38 = vmul.f32 -1.442695, %v3112_v35 }
0x1b67   :  { %v2695_v45 = vmul.f32 -1.442695, %v3113_v39 }
0x1b68   :  { %3241 = vpow2.f32 %v2694_v38 }
0x1b69   :  { %3243 = vtanh.f32 %v3113_v39 }
0x1b72   :  { %v3242_v40 = vpop.eup %3241 }
0x1b73   :  { %v1802_v41 = vadd.f32 1.0, %v3242_v40  ;;  %v3244_v42 = vpop.eup %3243 }
0x1b75   :  { %3245 = vrcp.f32 %v1802_v41 }
0x1b76   :  { %3247 = vpow2.f32 %v2695_v45 }
0x1b7f   :  { %v3246_v43 = vpop.eup %3245 }
0x1b80   :  { %v1813_v44 = vmul.f32 %v3246_v43, %v3244_v42  ;;  %v3248_v11 = vpop.eup %3247  ;;  %v1812_v47 = vmul.f32 %v3246_v43, %v3713_v52 }
0x1b81   :  { %v1809_v46 = vadd.f32 1.0, %v3248_v11 }
0x1b82   :  { %1815 = vrot.lane.b32.xlu1 %v1813_v44, %s3354_s3 }
0x1b83   :  { %3249 = vrcp.f32 %v1809_v46 }
0x1b8d   :  { %v3250_v51 = vpop.eup %3249 }
0x1bf4   :  { %v1816_v48 = vpop.permute.xlu1 %1815 }
0x1bf5   :  { %v3750_v50 = vadd.f32 %v1816_v48, %v1812_v47  ;;  %v3800_v47 = vld [vmem:[%s3886_s5 + $0x8] sm:$0xff] }
0x1bf7   :  { %3251 = vtanh.f32 %v3750_v50 }
0x1c01   :  { %v3252_v58 = vpop.eup %3251 }
0x1c02   :  { %v1820_v59 = vmul.f32 %v3252_v58, %v3250_v51  ;;  %v3806_v51 = vld [vmem:[%s3886_s5] sm:$0xff] }
0x1c04   :  { %1824 = vrot.lane.b32.xlu1 %v1820_v59, %s3354_s3  ;;  %1822 = vrot.lane.b32.xlu0 %v1820_v59, %s3355_s13 }
0x1c76   :  { %v1825_v60 = vpop.permute.xlu1 %1824  ;;  %v1823_v61 = vpop.permute.xlu0 %1822 }
0x1c77   :  { %2892 = vmatprep.mubr.msk.f32.mxu1 %vm234_vm1, %v1825_v60  ;;  %1826 = vrot.lane.b32.xlu1 %v1823_v61, %s3354_s3 }
0x1ce9   :  { %v1827_v52 = vpop.permute.xlu1 %1826 }
0x1cea   :  { %2893 = vmatmul.mubr.msk.f32.vlgmr.msra.gmra.mrb[20].mxu1 %vm234_vm1, %v1827_v52 }
0x1ceb   :  { %3061 = vmatpush3.bf16.msra.mxu1 %v3566_v23 }
0x1cec   :  { %3071 = vmatprep.subr.bf16.mxu1 %v3528_v53 }
0x1dbd   :  { %v2894_v0 = vpop.f32.mrb[20].mxu1 }
0x1dbe   :  { %v1904_v54 = vadd.f32 %v2894_v0, %v3547_v62  ;;  %v1898_v56 = vpop.f32.mrb[21].mxu1 }
0x1dbf   :  { %v1899_v57 = vadd.f32 %v1898_v56, %v3552_v63 }
0x1dc0   :  { %v1910_v49 = vsel %vm57_vm0, %v1904_v54, -inf }
0x1dc1   :  { %1911 = vmax.xlane.f32.xlu1 %v1910_v49  ;;  %v1907_v1 = vsel %vm57_vm0, %v1899_v57, -inf }
0x1dc2   :  { %1908 = vmax.xlane.f32.xlu0 %v1907_v1 }
0x1e4e   :  { %v1912_v2 = vpop.xlane.xlu1 %1911 }
0x1e4f   :  { %v1914_v3 = vsub.f32 %v1904_v54, %v1912_v2  ;;  %v1909_v4 = vpop.xlane.xlu0 %1908 }
0x1e50   :  { %v1913_v6 = vsub.f32 %v1899_v57, %v1909_v4 }
0x1e51   :  { %v1917_v7 = vmul.f32 1.442695, %v1914_v3 }
0x1e52   :  { %v1915_v8 = vmul.f32 1.442695, %v1913_v6 }
0x1e54   :  { %3253 = vpow2.f32 %v1915_v8 }
0x1e55   :  { %3255 = vpow2.f32 %v1917_v7 }
0x1e5e   :  { %v3254_v9 = vpop.eup %3253 }
0x1e5f   :  { %v1919_v62 = vsel %vm57_vm0, %v3254_v9, 0.0  ;;  %v3256_v10 = vpop.eup %3255 }
0x1e60   :  { %1920 = vadd.xlane.f32.xlu0 %v1919_v62  ;;  %v1922_v63 = vsel %vm57_vm0, %v3256_v10, 0.0 }
0x1e64   :  { %1923 = vadd.xlane.f32.xlu0 %v1922_v63  ;;  %v3823_v63 = vld [vmem:[%s3888_s7 + $0x8] sm:$0xff] }
0x1eed   :  { %v1921_v12 = vpop.xlane.xlu0 %1920 }
0x1eee   :  { %3257 = vrcp.f32 %v1921_v12 }
0x1ef1   :  { %v1924_v14 = vpop.xlane.xlu0 %1923 }
0x1ef2   :  { %3259 = vrcp.f32 %v1924_v14 }
0x1ef8   :  { %v3258_v15 = vpop.eup %3257 }
0x1ef9   :  { %v1927_v17 = vmul.f32 %v3258_v15, %v3254_v9  ;;  %v3829_v15 = vld [vmem:[%s3888_s7] sm:$0xff]  ;;  %s3356_s7 = smov [#allocation5]  }
0x1efb   :  { %2899 = vmatprep.mubr.msk.f32.mxu1 %vm57_vm0, %v1927_v17  ;;  %2014 = vst.msk [vmem:[#allocation5 + $0x50] sm:$0xff] %vm57_vm0, %v1927_v17 }
0x1efc   :  { %v3260_v18 = vpop.eup %3259 }
0x1efd   :  { %v1928_v19 = vmul.f32 %v3260_v18, %v3256_v10 }
0x1eff   :  { %2015 = vst.msk [vmem:[#allocation5 + $0x58] sm:$0xff] %vm57_vm0, %v1928_v19  ;;  %2900 = vmatmul.mubr.msk.f32.vlgmr.msra.gmra.mrb[22].mxu1 %vm57_vm0, %v1928_v19 }
0x1f00   :  { %3073 = vmatpush3.bf16.msra.mxu1 %v3528_v53 }
0x1f01   :  { %3075 = vmatprep.subr.bf16.mxu1 %v3533_v55 }
0x1f04   :  { %3077 = vmatpush3.bf16.msra.mxu1 %v3533_v55 }
0x1f05   :  { %3079 = vmatprep.subr.bf16.mxu1 %v3566_v23 }
0x1fd2   :  { %v2901_v21 = vpop.f32.mrb[22].mxu1 }
0x1fd3   :  { %v2007_v22 = vadd.f32 %v2901_v21, %v3582_v30  ;;  %v2001_v24 = vpop.f32.mrb[23].mxu1 }
0x1fd4   :  { %v2002_v25 = vadd.f32 %v2001_v24, %v3587_v32 }
0x1fd6   :  { %v2010_v26 = vmul.f32 %v2007_v22, %v2002_v25 }
0x1fd8   :  { %2012 = vst.msk [vmem:[#allocation3 + $0x28] sm:$0xff] %vm234_vm1, %v2010_v26  ;;  %2700 = vmatmul.mubr.msk.f32.vlgmr.msra.gmra.mrb[12].mxu0 %vm234_vm1, %v2010_v26 }
0x1fd9   :  { %3085 = vmatpush1.bf16.msra.mxu0 %v3440_v13  ;;  %2386 = vmatprep.mubr.f32.mxu0 %v3353_v5 }
0x1fda   :  { %3087 = vmatprep.subr.bf16.mxu0 %v3449_v16 }
0x1fdd   :  { %3089 = vmatpush1.bf16.msra.mxu0 %v3463_v20 }
0x1fde   :  { %3099 = vmatprep.subr.bf16.mxu0 %v3566_v23 }
0x20ab   :  { %v2090_v27 = vpop.f32.mrb[12].mxu0 }
0x20ac   :  { %v3114_v30 = vadd.f32 %v2090_v27, %v3509_v31  ;;  %v2092_v28 = vpop.f32.mrb[13].mxu0 }
0x20ad   :  { %v3115_v29 = vadd.f32 %v2092_v28, %v3512_v37 }
0x20ae   :  { %v2701_v32 = vmul.f32 -1.442695, %v3114_v30 }
0x20af   :  { %v2702_v16 = vmul.f32 -1.442695, %v3115_v29 }
0x20b0   :  { %3261 = vpow2.f32 %v2701_v32 }
0x20b1   :  { %3263 = vtanh.f32 %v3115_v29 }
0x20ba   :  { %v3262_v33 = vpop.eup %3261 }
0x20bb   :  { %v2100_v34 = vadd.f32 1.0, %v3262_v33  ;;  %v3264_v13 = vpop.eup %3263 }
0x20bd   :  { %3265 = vrcp.f32 %v2100_v34 }
0x20be   :  { %3267 = vpow2.f32 %v2702_v16 }
0x20c7   :  { %v3266_v5 = vpop.eup %3265 }
0x20c8   :  { %v2111_v35 = vmul.f32 %v3266_v5, %v3264_v13  ;;  %v3268_v20 = vpop.eup %3267  ;;  %v2110_v38 = vmul.f32 %v3266_v5, %v3750_v50 }
0x20c9   :  { %v2107_v36 = vadd.f32 1.0, %v3268_v20 }
0x20ca   :  { %2113 = vrot.lane.b32.xlu1 %v2111_v35, %s3354_s3 }
0x20cb   :  { %3269 = vrcp.f32 %v2107_v36 }
0x20d5   :  { %v3270_v41 = vpop.eup %3269 }
0x213c   :  { %v2114_v39 = vpop.permute.xlu1 %2113 }
0x213d   :  { %v3787_v40 = vadd.f32 %v2114_v39, %v2110_v38 }
0x213f   :  { %3271 = vtanh.f32 %v3787_v40 }
0x2149   :  { %v3272_v42 = vpop.eup %3271 }
0x214a   :  { %v2118_v43 = vmul.f32 %v3272_v42, %v3270_v41 }
0x214c   :  { %2122 = vrot.lane.b32.xlu1 %v2118_v43, %s3354_s3  ;;  %2120 = vrot.lane.b32.xlu0 %v2118_v43, %s3355_s13 }
0x21be   :  { %v2123_v44 = vpop.permute.xlu1 %2122  ;;  %v2121_v45 = vpop.permute.xlu0 %2120 }
0x21bf   :  { %2910 = vmatprep.mubr.msk.f32.mxu1 %vm234_vm1, %v2123_v44  ;;  %2124 = vrot.lane.b32.xlu1 %v2121_v45, %s3354_s3 }
0x2231   :  { %v2125_v11 = vpop.permute.xlu1 %2124 }
0x2232   :  { %2911 = vmatmul.mubr.msk.f32.vlgmr.msra.gmra.mrb[24].mxu1 %vm234_vm1, %v2125_v11 }
0x2233   :  { %3081 = vmatpush3.bf16.msra.mxu1 %v3566_v23 }
0x2234   :  { %3091 = vmatprep.subr.bf16.mxu1 %v3528_v53 }
0x2305   :  { %v2912_v46 = vpop.f32.mrb[24].mxu1 }
0x2306   :  { %v2202_v48 = vadd.f32 %v3800_v47, %v2912_v46  ;;  %v2196_v50 = vpop.f32.mrb[25].mxu1 }
0x2307   :  { %v2197_v58 = vadd.f32 %v3806_v51, %v2196_v50 }
0x2308   :  { %v2208_v59 = vsel %vm57_vm0, %v2202_v48, -inf }
0x2309   :  { %2209 = vmax.xlane.f32.xlu1 %v2208_v59  ;;  %v2205_v60 = vsel %vm57_vm0, %v2197_v58, -inf }
0x230a   :  { %2206 = vmax.xlane.f32.xlu0 %v2205_v60 }
0x2396   :  { %v2210_v61 = vpop.xlane.xlu1 %2209 }
0x2397   :  { %v2212_v52 = vsub.f32 %v2202_v48, %v2210_v61  ;;  %v2207_v0 = vpop.xlane.xlu0 %2206 }
0x2398   :  { %v2211_v54 = vsub.f32 %v2197_v58, %v2207_v0 }
0x2399   :  { %v2215_v56 = vmul.f32 1.442695, %v2212_v52 }
0x239a   :  { %v2213_v57 = vmul.f32 1.442695, %v2211_v54 }
0x239c   :  { %3273 = vpow2.f32 %v2213_v57 }
0x239d   :  { %3275 = vpow2.f32 %v2215_v56 }
0x23a6   :  { %v3274_v49 = vpop.eup %3273 }
0x23a7   :  { %v2217_v1 = vsel %vm57_vm0, %v3274_v49, 0.0  ;;  %v3276_v2 = vpop.eup %3275 }
0x23a8   :  { %2218 = vadd.xlane.f32.xlu0 %v2217_v1  ;;  %v2220_v3 = vsel %vm57_vm0, %v3276_v2, 0.0 }
0x23ac   :  { %2221 = vadd.xlane.f32.xlu0 %v2220_v3 }
0x2435   :  { %v2219_v4 = vpop.xlane.xlu0 %2218 }
0x2436   :  { %3277 = vrcp.f32 %v2219_v4 }
0x2439   :  { %v2222_v6 = vpop.xlane.xlu0 %2221 }
0x243a   :  { %3279 = vrcp.f32 %v2222_v6 }
0x2440   :  { %v3278_v7 = vpop.eup %3277 }
0x2441   :  { %v2225_v8 = vmul.f32 %v3278_v7, %v3274_v49 }
0x2443   :  { %2917 = vmatprep.mubr.msk.f32.mxu1 %vm57_vm0, %v2225_v8  ;;  %2312 = vst.msk [vmem:[#allocation5 + $0x60] sm:$0xff] %vm57_vm0, %v2225_v8 }
0x2444   :  { %v3280_v9 = vpop.eup %3279 }
0x2445   :  { %v2226_v62 = vmul.f32 %v3280_v9, %v3276_v2 }
0x2447   :  { %2313 = vst.msk [vmem:[#allocation5 + $0x68] sm:$0xff] %vm57_vm0, %v2226_v62  ;;  %2918 = vmatmul.mubr.msk.f32.vlgmr.msra.gmra.mrb[26].mxu1 %vm57_vm0, %v2226_v62 }
0x2448   :  { %3093 = vmatpush3.bf16.msra.mxu1 %v3528_v53 }
0x2449   :  { %3095 = vmatprep.subr.bf16.mxu1 %v3533_v55 }
0x244c   :  { %3097 = vmatpush3.bf16.msra.mxu1 %v3533_v55 }
0x251a   :  { %v2919_v10 = vpop.f32.mrb[26].mxu1 }
0x251b   :  { %v2305_v12 = vadd.f32 %v3823_v63, %v2919_v10  ;;  %v2299_v14 = vpop.f32.mrb[27].mxu1 }
0x251c   :  { %v2300_v53 = vadd.f32 %v3829_v15, %v2299_v14 }
0x251e   :  { %v2308_v17 = vmul.f32 %v2305_v12, %v2300_v53 }
0x2520   :  { %2310 = vst.msk [vmem:[#allocation3 + $0x30] sm:$0xff] %vm234_vm1, %v2308_v17  ;;  %2707 = vmatmul.mubr.msk.f32.vlgmr.msra.gmra.mrb[14].mxu0 %vm234_vm1, %v2308_v17 }
0x2521   :  { %3101 = vmatpush3.bf16.msra.mxu0 %v3566_v23 }
0x25f3   :  { %v2388_v55 = vpop.f32.mrb[14].mxu0 }
0x25f4   :  { %v3116_v18 = vadd.f32 %v2388_v55, %v3509_v31  ;;  %v2390_v19 = vpop.f32.mrb[15].mxu0 }
0x25f5   :  { %v3117_v22 = vadd.f32 %v2390_v19, %v3512_v37 }
0x25f6   :  { %v2708_v21 = vmul.f32 -1.442695, %v3116_v18 }
0x25f7   :  { %v2709_v28 = vmul.f32 -1.442695, %v3117_v22 }
0x25f8   :  { %3281 = vpow2.f32 %v2708_v21 }
0x25f9   :  { %3283 = vtanh.f32 %v3117_v22 }
0x2602   :  { %v3282_v24 = vpop.eup %3281 }
0x2603   :  { %v2398_v25 = vadd.f32 1.0, %v3282_v24  ;;  %v3284_v26 = vpop.eup %3283 }
0x2605   :  { %3285 = vrcp.f32 %v2398_v25 }
0x2606   :  { %3287 = vpow2.f32 %v2709_v28 }
0x260f   :  { %v3286_v27 = vpop.eup %3285 }
0x2610   :  { %v2409_v30 = vmul.f32 %v3286_v27, %v3284_v26  ;;  %v3288_v23 = vpop.eup %3287  ;;  %v2408_v31 = vmul.f32 %v3286_v27, %v3787_v40 }
0x2611   :  { %v2405_v32 = vadd.f32 1.0, %v3288_v23 }
0x2612   :  { %2411 = vrot.lane.b32.xlu1 %v2409_v30, %s3354_s3 }
0x2613   :  { %3289 = vrcp.f32 %v2405_v32 }
0x261d   :  { %v3290_v37 = vpop.eup %3289 }
0x2684   :  { %v2412_v29 = vpop.permute.xlu1 %2411 }
0x2685   :  { %v2414_v33 = vadd.f32 %v2412_v29, %v2408_v31 }
0x2687   :  { %3291 = vtanh.f32 %v2414_v33 }
0x2691   :  { %v3292_v34 = vpop.eup %3291 }
0x2692   :  { %v2416_v13 = vmul.f32 %v3292_v34, %v3290_v37 }
0x2694   :  { %2420 = vrot.lane.b32.xlu1 %v2416_v13, %s3354_s3  ;;  %2418 = vrot.lane.b32.xlu0 %v2416_v13, %s3355_s13 }
0x2706   :  { %v2421_v5 = vpop.permute.xlu1 %2420  ;;  %v2419_v35 = vpop.permute.xlu0 %2418 }
0x2707   :  { %2928 = vmatprep.mubr.msk.f32.mxu1 %vm234_vm1, %v2421_v5  ;;  %2422 = vrot.lane.b32.xlu1 %v2419_v35, %s3354_s3  ;;  %s2629_s3 = sshll.u32 %s3356_s7, 4  ;;  %s2630_s3 = int_to_ptr.vmem [resolvable:$true] %s2629_s3 }
0x2708   :  { %s3305_s28 = scalar_lea.vmem %s2630_s3, 2048  ;;  %p3310_p1 = scmp.lt.s32.totalorder %s2630_s3, %s2630_s3 }
0x2709   :  { %p3306_p0 = scmp.ne.s32.totalorder %s2630_s3, %s3305_s28  ;;  %p3311_p2 = scmp.lt.s32.totalorder %s3305_s28, %s3305_s28 }
0x270b   :  { %p3312_p3 = por %p3311_p2, %p3310_p1 }
0x270d   :  { %p3313_p4 = pnand %p3312_p3, %p3306_p0 }
0x2779   :  { %v2423_v16 = vpop.permute.xlu1 %2422 }
0x277a   :  { %2929 = vmatmul.mubr.msk.f32.vlgmr.msra.gmra.mrb[28].mxu1 %vm234_vm1, %v2423_v16 }
0x284d   :  { %v2930_v20 = vpop.f32.mrb[28].mxu1 }
0x284e   :  { %v2500_v36 = vadd.f32 %v3800_v47, %v2930_v20  ;;  %v2494_v38 = vpop.f32.mrb[29].mxu1 }
0x284f   :  { %v2495_v39 = vadd.f32 %v3806_v51, %v2494_v38 }
0x2850   :  { %v2506_v40 = vsel %vm57_vm0, %v2500_v36, -inf }
0x2851   :  { %2507 = vmax.xlane.f32.xlu1 %v2506_v40  ;;  %v2503_v41 = vsel %vm57_vm0, %v2495_v39, -inf }
0x2852   :  { %2504 = vmax.xlane.f32.xlu0 %v2503_v41 }
0x28de   :  { %v2508_v42 = vpop.xlane.xlu1 %2507 }
0x28df   :  { %v2510_v43 = vsub.f32 %v2500_v36, %v2508_v42  ;;  %v2505_v44 = vpop.xlane.xlu0 %2504 }
0x28e0   :  { %v2509_v45 = vsub.f32 %v2495_v39, %v2505_v44 }
0x28e1   :  { %v2513_v11 = vmul.f32 1.442695, %v2510_v43 }
0x28e2   :  { %v2511_v46 = vmul.f32 1.442695, %v2509_v45 }
0x28e4   :  { %3293 = vpow2.f32 %v2511_v46 }
0x28e5   :  { %3295 = vpow2.f32 %v2513_v11 }
0x28ee   :  { %v3294_v48 = vpop.eup %3293 }
0x28ef   :  { %v2515_v47 = vsel %vm57_vm0, %v3294_v48, 0.0  ;;  %v3296_v50 = vpop.eup %3295 }
0x28f0   :  { %2516 = vadd.xlane.f32.xlu0 %v2515_v47  ;;  %v2518_v51 = vsel %vm57_vm0, %v3296_v50, 0.0 }
0x28f4   :  { %2519 = vadd.xlane.f32.xlu0 %v2518_v51 }
0x297d   :  { %v2517_v58 = vpop.xlane.xlu0 %2516 }
0x297e   :  { %3297 = vrcp.f32 %v2517_v58 }
0x2981   :  { %v2520_v59 = vpop.xlane.xlu0 %2519 }
0x2982   :  { %3299 = vrcp.f32 %v2520_v59 }
0x2988   :  { %v3298_v60 = vpop.eup %3297 }
0x2989   :  { %v2523_v61 = vmul.f32 %v3298_v60, %v3294_v48 }
0x298b   :  { %2935 = vmatprep.mubr.msk.f32.mxu0 %vm57_vm0, %v2523_v61  ;;  %2610 = vst.msk [vmem:[#allocation5 + $0x70] sm:$0xff] %vm57_vm0, %v2523_v61 }
0x298c   :  { %v3300_v52 = vpop.eup %3299 }
0x298d   :  { %v2524_v0 = vmul.f32 %v3300_v52, %v3296_v50 }
0x298f   :  { %2611 = vst.msk [vmem:[#allocation5 + $0x78] sm:$0xff] %vm57_vm0, %v2524_v0  ;;  %2936 = vmatmul.mubr.msk.f32.vlgmr.msra.gmra.mrb[16].mxu0 %vm57_vm0, %v2524_v0 }
0x2990   :  { %3316 = shalt.err (!%p3313_p4)
}
0x2991   :  { %s3317_s10 = scalar_lea.hbm %s3890_s9, 2048 }
0x2992   :  { %p3318_p5 = scmp.ne.s32.totalorder %s3890_s9, %s3317_s10  ;;  %p3321_p6 = scmp.lt.u32.totalorder %s3317_s10, %s3890_s9 }
0x2994   :  { %p3323_p7 = pnand %p3321_p6, %p3318_p5 }
0x2996   :  { %3326 = shalt.err (!%p3323_p7)
}
0x2997   :  { %s3357_s14 = smov 128   ;;  %s3358_s2 = smov 8  }
0x2998   :  { %2635 = dma.vmem_to_hbm [thread:$0]  %s2630_s3, 2048, %s3890_s9, [#allocation6], %s3357_s14, %s3357_s14, %s3358_s2  }
0x2999   :  { %s3359_s17 = smov [#allocation3]  }
0x299a   :  { %s2617_s18 = sshll.u32 %s3359_s17, 4  ;;  %s2618_s18 = int_to_ptr.vmem [resolvable:$true] %s2617_s18 }
0x299b   :  { %s3327_s19 = scalar_lea.vmem %s2618_s18, 1024  ;;  %p3332_p9 = scmp.lt.s32.totalorder %s2618_s18, %s2618_s18 }
0x299c   :  { %p3328_p8 = scmp.ne.s32.totalorder %s2618_s18, %s3327_s19  ;;  %p3333_p10 = scmp.lt.s32.totalorder %s3327_s19, %s3327_s19 }
0x299e   :  { %p3334_p11 = por %p3333_p10, %p3332_p9 }
0x29a0   :  { %p3335_p12 = pnand %p3334_p11, %p3328_p8 }
0x2a62   :  { %v2937_v54 = vpop.f32.mrb[16].mxu0 }
0x2a63   :  { %v2603_v56 = vadd.f32 %v3823_v63, %v2937_v54  ;;  %v2597_v57 = vpop.f32.mrb[17].mxu0 }
0x2a64   :  { %v2598_v49 = vadd.f32 %v3829_v15, %v2597_v57 }
0x2a66   :  { %v2606_v1 = vmul.f32 %v2603_v56, %v2598_v49 }
0x2a68   :  { %2608 = vst.msk [vmem:[#allocation3 + $0x38] sm:$0xff] %vm234_vm1, %v2606_v1 }
0x2a69   :  { %3338 = shalt.err (!%p3335_p12)
}
0x2a6a   :  { %s3339_s20 = scalar_lea.hbm %s3889_s8, 1024 }
0x2a6b   :  { %p3340_p13 = scmp.ne.s32.totalorder %s3889_s8, %s3339_s20  ;;  %p3343_p0 = scmp.lt.u32.totalorder %s3339_s20, %s3889_s8 }
0x2a6d   :  { %p3345_p1 = pnand %p3343_p0, %p3340_p13 }
0x2a6f   :  { %3348 = shalt.err (!%p3345_p1)
}
0x2a70   :  { %2623 = dma.vmem_to_hbm [thread:$0]  %s2618_s18, 1024, %s3889_s8, [#allocation4], %s3357_s14, %s3357_s14, %s3358_s2  }
0x2a71   :  { %3349 = dma.done.wait [#allocation4], 1024  }
0x2a72   :  { %3350 = vsyncadd [#allocation4], 4294966272 }
0x2a73   :  { %3351 = dma.done.wait [#allocation6], 2048  }
0x2a74   :  { %3352 = vsyncadd [#allocation6], 4294965248 }
0x2a75   :  { %2642 = vsyncpa [#allocation4], 1 }
0x2a76   :  { %2643 = vsyncpa [#allocation6], 1 }

</bundles_post_ra>
